<compile_context>
chip_gen: v6e
topology: v6e:2x2x1
jax: 0.10.0
libtpu: 0.0.40
codegen_flags: <defaults>
</compile_context>

<pallas_src>
import jax
import jax.numpy as jnp
from jax.experimental import pallas as pl
from jax.experimental.pallas import tpu as pltpu


def _round_up(x, m):
    return -(-x // m) * m


def make_lstm_mlp_kernel(n_layers, H, Gp, T, Bp):
    """Layer-major multilayer LSTM + (Linear -> ReLU -> Linear) head, all in one kernel.

    Gate layout: PyTorch order (i, f, g, o), each H lanes wide, packed into Gp lanes.
    """

    def kernel(*refs):
        # inputs: x2d, w_ih[0..L), w_hh[0..L), bias[0..L), fc1_w, fc1_b, fc2_w, fc2_b
        # outputs: out_ref ; scratch: zall_sc, seq_sc
        x_ref = refs[0]
        idx = 1
        w_ih = refs[idx:idx + n_layers]; idx += n_layers
        w_hh = refs[idx:idx + n_layers]; idx += n_layers
        bias = refs[idx:idx + n_layers]; idx += n_layers
        fc1_w, fc1_b, fc2_w, fc2_b = refs[idx:idx + 4]; idx += 4
        out_ref = refs[idx]; idx += 1
        zall_sc, seq_sc = refs[idx], refs[idx + 1]

        # Activation constants (hoisted once, full (Bp, Gp) so no per-step broadcast):
        #   sigmoid lanes (i,f,o): gate = 0.5*tanh(0.5*z) + 0.5   (one EUP pass, no exp/divide)
        #   tanh lanes    (g)    : gate = 1.0*tanh(1.0*z) + 0.0
        # The argument scale equals the output scale, so one mask serves both.
        lane = jax.lax.broadcasted_iota(jnp.int32, (Bp, Gp), 1)
        is_g = jnp.logical_and(lane >= 2 * H, lane < 3 * H)
        act_scale = jnp.where(is_g, 1.0, 0.5).astype(jnp.float32)
        act_shift = jnp.where(is_g, 0.0, 0.5).astype(jnp.float32)

        # Full unroll for short T; partial unroll otherwise (overlap across steps).
        unr = T if T <= 16 else 4

        last_h = jnp.zeros((Bp, H), jnp.float32)
        for l in range(n_layers):
            w_in = w_ih[l][...]          # (in_dim, Gp)
            w_rec = w_hh[l][...]         # (H, Gp)
            b = bias[l][...]             # (1, Gp) f32 (b_ih + b_hh)

            # (1) Batched input projection for ALL timesteps (no time dependence).
            inp_all = x_ref[...] if l == 0 else seq_sc[...]   # (T*Bp, in_dim)
            zall_sc[...] = (
                jnp.dot(inp_all.astype(w_in.dtype), w_in,
                        preferred_element_type=jnp.float32) + b)

            is_last_layer = (l == n_layers - 1)

            # (2) Serial recurrence: only h @ W_hh + gate math on the critical path.
            # TODO(synk): hold the loop-invariant W_hh in MXU weight registers across timesteps
            # (pltpu.matmul_push_rhs once per layer + matmul_acc_lhs/matmul_pop per step).
            def step(t, carry, w_rec=w_rec, is_last_layer=is_last_layer):
                h, c = carry
                row = pl.multiple_of(t * Bp, Bp)
                z = zall_sc[pl.ds(row, Bp), :] + jnp.dot(
                    h.astype(w_rec.dtype), w_rec,
                    preferred_element_type=jnp.float32)
                a = jnp.tanh(z * act_scale)           # single EUP pass for all 4 gates
                gates = a * act_scale + act_shift     # sigmoid(i,f,o) / tanh(g)
                i_g = gates[:, 0 * H:1 * H]
                f_g = gates[:, 1 * H:2 * H]
                g_g = gates[:, 2 * H:3 * H]
                o_g = gates[:, 3 * H:4 * H]
                c_new = f_g * c + i_g * g_g
                h_new = o_g * jnp.tanh(c_new)
                if not is_last_layer:                 # top layer's sequence is never read
                    seq_sc[pl.ds(row, Bp), :] = h_new
                return (h_new, c_new)

            h0 = jnp.zeros((Bp, H), jnp.float32)
            c0 = jnp.zeros((Bp, H), jnp.float32)
            last_h, _ = jax.lax.fori_loop(0, T, step, (h0, c0), unroll=unr)

        # (3) FC head on the last-timestep output of the top LSTM layer.
        fw1 = fc1_w[...]; fb1 = fc1_b[...]
        fw2 = fc2_w[...]; fb2 = fc2_b[...]
        y = jnp.dot(last_h.astype(fw1.dtype), fw1,
                    preferred_element_type=jnp.float32) + fb1
        y = jnp.maximum(y, 0.0)
        out_ref[...] = (jnp.dot(y.astype(fw2.dtype), fw2,
                                preferred_element_type=jnp.float32)
                        + fb2).astype(out_ref.dtype)

    return kernel


def model_lstm_2_forward(x_btd, kparams, *, n_layers, hidden_n, n_class):
    """x_btd: (B, T, input_size) as in the PyTorch module (batch_first)."""
    B, T, I = x_btd.shape
    H = kparams["H"]
    Gp = kparams["Gp"]
    Np = kparams["Np"]
    assert H == hidden_n
    Bp = max(8, _round_up(B, 8))     # fill f32 sublanes; padded rows are zero and sliced off

    # time-major, pad batch, flatten to (T*Bp, I) so layer-0 input projection is one matmul
    x = jnp.transpose(x_btd, (1, 0, 2)).astype(jnp.float32)     # (T, B, I)
    x = jnp.pad(x, ((0, 0), (0, Bp - B), (0, 0)))
    x2d = x.reshape(T * Bp, I)

    in_arrays = ([x2d] + list(kparams["w_ih"]) + list(kparams["w_hh"])
                 + list(kparams["bias"])
                 + [kparams["fc1_w"], kparams["fc1_b"],
                    kparams["fc2_w"], kparams["fc2_b"]])

    def full_spec(a):
        nd = a.ndim
        return pl.BlockSpec(a.shape, lambda i, nd=nd: (0,) * nd)
    # TODO(synk): loop-invariant weights are still double-buffered by the pipeline; for large H
    # single-buffer them (pipeline_mode=pl.Buffered(1) or pl.ANY + one sync_copy) to halve
    # weight VMEM on v7x.

    scratch = [pltpu.VMEM((T * Bp, Gp), jnp.float32),   # z_all: input projection, all timesteps
               pltpu.VMEM((T * Bp, H), jnp.float32)]    # per-layer h-sequence feeding next layer
    # TODO(synk): chunk z_all over time blocks (double-buffered) once T*Bp*Gp*4 bytes approaches
    # the VMEM budget (matters on v7x's 64 MiB / the 32 MiB scoped default).

    # Request only the VMEM actually needed (inputs/outputs double-buffered by the pipeline),
    # capped at 48 MiB to leave headroom on v7x (64 MiB physical per TensorCore).
    need = (sum(2 * a.size * a.dtype.itemsize for a in in_arrays)
            + 2 * Bp * Np * 4
            + T * Bp * (Gp + H) * 4
            + (2 << 20))                                # compiler-internal scratch headroom
    vmem_limit = min(max(need, 16 << 20), 48 << 20)
    vmem_limit = max(vmem_limit, need)

    out = pl.pallas_call(
        make_lstm_mlp_kernel(n_layers, H, Gp, T, Bp),
        out_shape=jax.ShapeDtypeStruct((Bp, Np), jnp.float32),
        grid_spec=pltpu.PrefetchScalarGridSpec(
            num_scalar_prefetch=0,
            grid=(1,),   # everything resident in VMEM; time handled by in-kernel fori_loop
            in_specs=[full_spec(a) for a in in_arrays],
            out_specs=pl.BlockSpec((Bp, Np), lambda i: (0, 0)),
            scratch_shapes=scratch,
        ),
        compiler_params=pltpu.CompilerParams(
            dimension_semantics=("arbitrary",),
            vmem_limit_bytes=int(vmem_limit),
        ),
    )(*in_arrays)
    # TODO(synk): for large B on v7x, add a leading "parallel" batch grid axis (split Bp across
    # the 2 TensorCores) instead of grid=(1,).
    return out[:B, :n_class]


def init_torch_params(key, input_size, hidden_n, n_layers, n_class):
    """Deterministic PyTorch-layout params: weight_ih (4H,in), weight_hh (4H,H), biases (4H,),
    gate order (i, f, g, o); fc weights (out, in)."""
    H = hidden_n
    k = key
    p = {"w_ih": [], "w_hh": [], "b_ih": [], "b_hh": []}
    s = 1.0 / jnp.sqrt(H)
    for l in range(n_layers):
        in_dim = input_size if l == 0 else H
        k, k1, k2, k3, k4 = jax.random.split(k, 5)
        p["w_ih"].append(jax.random.uniform(k1, (4 * H, in_dim), jnp.float32, -s, s))
        p["w_hh"].append(jax.random.uniform(k2, (4 * H, H), jnp.float32, -s, s))
        p["b_ih"].append(jax.random.uniform(k3, (4 * H,), jnp.float32, -s, s))
        p["b_hh"].append(jax.random.uniform(k4, (4 * H,), jnp.float32, -s, s))
    k, k1, k2, k3, k4 = jax.random.split(k, 5)
    s1 = 1.0 / jnp.sqrt(H)
    p["fc1_w"] = jax.random.uniform(k1, (128, H), jnp.float32, -s1, s1)
    p["fc1_b"] = jax.random.uniform(k2, (128,), jnp.float32, -s1, s1)
    s2 = 1.0 / jnp.sqrt(128.0)
    p["fc2_w"] = jax.random.uniform(k3, (n_class, 128), jnp.float32, -s2, s2)
    p["fc2_b"] = jax.random.uniform(k4, (n_class,), jnp.float32, -s2, s2)
    return p


def prepare_params(tparams, *, input_size, hidden_n, n_layers, n_class,
                   matmul_dtype=jnp.bfloat16):
    """Convert PyTorch-layout params to the kernel layout:
    transpose, combine biases, keep torch gate order (i,f,g,o) packed contiguously and pad the
    gate axis to Gp = round_up(4H, 128) lanes; pad FC output to Np lanes. Zero padding keeps
    padded lanes inert. Weights default to bf16 (f32 accumulation in-kernel)."""
    H = hidden_n
    G = 4 * H
    Gp = _round_up(G, 128)
    Np = _round_up(n_class, 128)

    def pad_cols(w, cols):
        return jnp.pad(w, ((0, 0), (0, cols - w.shape[1])))

    kp = {"H": H, "Gp": Gp, "Np": Np, "w_ih": [], "w_hh": [], "bias": []}
    for l in range(n_layers):
        w_ih = pad_cols(tparams["w_ih"][l].T, Gp)     # (in_dim, Gp)
        w_hh = pad_cols(tparams["w_hh"][l].T, Gp)     # (H, Gp)
        b = pad_cols((tparams["b_ih"][l] + tparams["b_hh"][l]).reshape(1, G), Gp)
        kp["w_ih"].append(w_ih.astype(matmul_dtype))
        kp["w_hh"].append(w_hh.astype(matmul_dtype))
        kp["bias"].append(b.astype(jnp.float32))
    kp["fc1_w"] = tparams["fc1_w"].T.astype(matmul_dtype)               # (H, 128)
    kp["fc1_b"] = tparams["fc1_b"].reshape(1, 128).astype(jnp.float32)
    kp["fc2_w"] = pad_cols(tparams["fc2_w"].T, Np).astype(matmul_dtype)  # (128, Np)
    kp["fc2_b"] = pad_cols(tparams["fc2_b"].reshape(1, n_class), Np).astype(jnp.float32)
    return kp


def reference_forward(x_btd, tparams, *, n_layers, hidden_n, n_class):
    """Pure-JAX reference mirroring torch nn.LSTM semantics (torch-layout params, f32)."""
    H = hidden_n
    x = jnp.transpose(x_btd, (1, 0, 2)).astype(jnp.float32)   # (T, B, I)
    T, B, _ = x.shape
    h = [jnp.zeros((B, H), jnp.float32) for _ in range(n_layers)]
    c = [jnp.zeros((B, H), jnp.float32) for _ in range(n_layers)]
    last = None
    for t in range(T):
        inp = x[t]
        for l in range(n_layers):
            z = (inp @ tparams["w_ih"][l].T + h[l] @ tparams["w_hh"][l].T
                 + tparams["b_ih"][l] + tparams["b_hh"][l])
            i_g = jax.nn.sigmoid(z[:, 0 * H:1 * H])
            f_g = jax.nn.sigmoid(z[:, 1 * H:2 * H])
            g_g = jnp.tanh(z[:, 2 * H:3 * H])
            o_g = jax.nn.sigmoid(z[:, 3 * H:4 * H])
            c[l] = f_g * c[l] + i_g * g_g
            h[l] = o_g * jnp.tanh(c[l])
            inp = h[l]
        last = inp
    y = jnp.maximum(last @ tparams["fc1_w"].T + tparams["fc1_b"], 0.0)
    return y @ tparams["fc2_w"].T + tparams["fc2_b"]


if __name__ == "__main__":
    # Small shapes consistent with the module's forward (batch_first LSTM input).
    B, T = 2, 8
    input_size, hidden_n, n_layers, n_class = 16, 32, 2, 10

    key = jax.random.PRNGKey(0)
    kx, kp = jax.random.split(key)
    x = jax.random.normal(kx, (B, T, input_size), jnp.float32)
    tparams = init_torch_params(kp, input_size, hidden_n, n_layers, n_class)

    ref = reference_forward(x, tparams, n_layers=n_layers,
                            hidden_n=hidden_n, n_class=n_class)

    # 1) Exact-math check with f32 weights (tight tolerance).
    kparams_f32 = prepare_params(tparams, input_size=input_size, hidden_n=hidden_n,
                                 n_layers=n_layers, n_class=n_class,
                                 matmul_dtype=jnp.float32)
    out_f32 = jax.block_until_ready(
        model_lstm_2_forward(x, kparams_f32, n_layers=n_layers,
                             hidden_n=hidden_n, n_class=n_class))
    assert out_f32.shape == (B, n_class)
    assert jnp.allclose(out_f32, ref, atol=1e-4, rtol=1e-4), (out_f32, ref)

    # 2) Performance default: bf16 weights (full-rate MXU, half the weight bytes),
    #    f32 accumulation/state — loosened tolerance covers the bf16 weight quantization.
    kparams = prepare_params(tparams, input_size=input_size, hidden_n=hidden_n,
                             n_layers=n_layers, n_class=n_class)   # bf16 default
    out = jax.block_until_ready(
        model_lstm_2_forward(x, kparams, n_layers=n_layers,
                             hidden_n=hidden_n, n_class=n_class))
    assert out.shape == (B, n_class)
    assert jnp.allclose(out, ref, atol=5e-2, rtol=5e-2), (out, ref)

    print("KERNEL_OK")
</pallas_src>

<mosaic_0001>
module attributes {stable_mosaic.version = 11 : i64} {
  func.func @kernel(%arg0: i32, %arg1: memref<64x16xf32, #tpu.memory_space<vmem>>, %arg2: memref<16x128xf32, #tpu.memory_space<vmem>>, %arg3: memref<32x128xf32, #tpu.memory_space<vmem>>, %arg4: memref<32x128xf32, #tpu.memory_space<vmem>>, %arg5: memref<32x128xf32, #tpu.memory_space<vmem>>, %arg6: memref<1x128xf32, #tpu.memory_space<vmem>>, %arg7: memref<1x128xf32, #tpu.memory_space<vmem>>, %arg8: memref<32x128xf32, #tpu.memory_space<vmem>>, %arg9: memref<1x128xf32, #tpu.memory_space<vmem>>, %arg10: memref<128x128xf32, #tpu.memory_space<vmem>>, %arg11: memref<1x128xf32, #tpu.memory_space<vmem>>, %arg12: memref<8x128xf32, #tpu.memory_space<vmem>>, %arg13: memref<64x128xf32, #tpu.memory_space<vmem>>, %arg14: memref<64x32xf32, #tpu.memory_space<vmem>>) attributes {dimension_semantics = [#tpu.dimension_semantics<arbitrary>], iteration_bounds = array<i64: 1>, scalar_prefetch = 0 : i64, scratch_operands = 2 : i64, tpu.core_type = #tpu.core_type<tc>, window_params = [{pipeline_mode = #tpu.pipeline_mode<synchronous>, transform_indices = @transform_0, window_bounds = array<i64: 64, 16>}, {pipeline_mode = #tpu.pipeline_mode<synchronous>, transform_indices = @transform_1, window_bounds = array<i64: 16, 128>}, {pipeline_mode = #tpu.pipeline_mode<synchronous>, transform_indices = @transform_2, window_bounds = array<i64: 32, 128>}, {pipeline_mode = #tpu.pipeline_mode<synchronous>, transform_indices = @transform_3, window_bounds = array<i64: 32, 128>}, {pipeline_mode = #tpu.pipeline_mode<synchronous>, transform_indices = @transform_4, window_bounds = array<i64: 32, 128>}, {pipeline_mode = #tpu.pipeline_mode<synchronous>, transform_indices = @transform_5, window_bounds = array<i64: 1, 128>}, {pipeline_mode = #tpu.pipeline_mode<synchronous>, transform_indices = @transform_6, window_bounds = array<i64: 1, 128>}, {pipeline_mode = #tpu.pipeline_mode<synchronous>, transform_indices = @transform_7, window_bounds = array<i64: 32, 128>}, {pipeline_mode = #tpu.pipeline_mode<synchronous>, transform_indices = @transform_8, window_bounds = array<i64: 1, 128>}, {pipeline_mode = #tpu.pipeline_mode<synchronous>, transform_indices = @transform_9, window_bounds = array<i64: 128, 128>}, {pipeline_mode = #tpu.pipeline_mode<synchronous>, transform_indices = @transform_10, window_bounds = array<i64: 1, 128>}, {pipeline_mode = #tpu.pipeline_mode<synchronous>, transform_indices = @transform_11, window_bounds = array<i64: 8, 128>}]} {
    %0 = tpu.iota {dimensions = array<i32: 1>} : vector<8x128xi32>
    %c64_i32 = arith.constant 64 : i32
    %1 = vector.broadcast %c64_i32 : i32 to vector<8x128xi32>
    %2 = arith.cmpi sge, %0, %1 : vector<8x128xi32>
    %c96_i32 = arith.constant 96 : i32
    %3 = vector.broadcast %c96_i32 : i32 to vector<8x128xi32>
    %4 = arith.cmpi slt, %0, %3 : vector<8x128xi32>
    %5 = arith.andi %2, %4 : vector<8x128xi1>
    %cst = arith.constant 1.000000e+00 : f32
    %cst_0 = arith.constant 5.000000e-01 : f32
    %6 = vector.broadcast %cst : f32 to vector<8x128xf32>
    %7 = vector.broadcast %cst_0 : f32 to vector<8x128xf32>
    %8 = arith.select %5, %6, %7 : vector<8x128xi1>, vector<8x128xf32>
    %cst_1 = arith.constant 0.000000e+00 : f32
    %cst_2 = arith.constant 5.000000e-01 : f32
    %9 = vector.broadcast %cst_1 : f32 to vector<8x128xf32>
    %10 = vector.broadcast %cst_2 : f32 to vector<8x128xf32>
    %11 = arith.select %5, %9, %10 : vector<8x128xi1>, vector<8x128xf32>
    %c0 = arith.constant 0 : index
    %c0_3 = arith.constant 0 : index
    %12 = vector.load %arg2[%c0, %c0_3] : memref<16x128xf32, #tpu.memory_space<vmem>>, vector<16x128xf32>
    %c0_4 = arith.constant 0 : index
    %c0_5 = arith.constant 0 : index
    %13 = vector.load %arg4[%c0_4, %c0_5] : memref<32x128xf32, #tpu.memory_space<vmem>>, vector<32x128xf32>
    %c0_6 = arith.constant 0 : index
    %c0_7 = arith.constant 0 : index
    %14 = vector.load %arg6[%c0_6, %c0_7] : memref<1x128xf32, #tpu.memory_space<vmem>>, vector<1x128xf32>
    %c0_8 = arith.constant 0 : index
    %c0_9 = arith.constant 0 : index
    %15 = vector.load %arg1[%c0_8, %c0_9] : memref<64x16xf32, #tpu.memory_space<vmem>>, vector<64x16xf32>
    %cst_10 = arith.constant dense<0.000000e+00> : vector<64x128xf32>
    %16 = tpu.matmul %15, %12, %cst_10 {dimension_numbers = #tpu.dot_dimension_numbers<[1], [0], [0], [1], [0, 0, 1, 1], [], []>} : vector<64x16xf32>, vector<16x128xf32>, vector<64x128xf32> -> vector<64x128xf32>
    %17 = vector.broadcast %14 : vector<1x128xf32> to vector<64x128xf32>
    %18 = arith.addf %16, %17 : vector<64x128xf32>
    %c0_11 = arith.constant 0 : index
    %c0_12 = arith.constant 0 : index
    %19 = vector.load %arg13[%c0_11, %c0_12] : memref<64x128xf32, #tpu.memory_space<vmem>>, vector<64x128xf32>
    tpu.vector_store %arg13[%c0_11, %c0_12], %18 {strides = array<i32>} : memref<64x128xf32, #tpu.memory_space<vmem>>, vector<64x128xf32>,
    %cst_13 = arith.constant 0.000000e+00 : f32
    %20 = vector.broadcast %cst_13 : f32 to vector<8x32xf32>
    %cst_14 = arith.constant 0.000000e+00 : f32
    %21 = vector.broadcast %cst_14 : f32 to vector<8x32xf32>
    %c0_i32 = arith.constant 0 : i32
    %c8_i32 = arith.constant 8 : i32
    %22 = arith.muli %c0_i32, %c8_i32 : i32
    %23 = tpu.assume_multiple %22, 8 : i32
    %24 = arith.index_cast %23 : i32 to index
    %c0_15 = arith.constant 0 : index
    %25 = vector.load %arg13[%24, %c0_15] : memref<64x128xf32, #tpu.memory_space<vmem>>, vector<8x128xf32>
    %cst_16 = arith.constant dense<0.000000e+00> : vector<8x128xf32>
    %26 = tpu.matmul %20, %13, %cst_16 {dimension_numbers = #tpu.dot_dimension_numbers<[1], [0], [0], [1], [0, 0, 1, 1], [], []>} : vector<8x32xf32>, vector<32x128xf32>, vector<8x128xf32> -> vector<8x128xf32>
    %27 = arith.addf %25, %26 : vector<8x128xf32>
    %28 = arith.mulf %27, %8 : vector<8x128xf32>
    %29 = math.tanh %28 : vector<8x128xf32>
    %30 = arith.mulf %29, %8 : vector<8x128xf32>
    %31 = arith.addf %30, %11 : vector<8x128xf32>
    %32 = vector.extract_strided_slice %31 {offsets = [0, 0], sizes = [8, 32], strides = [1, 1]} : vector<8x128xf32> to vector<8x32xf32>
    %33 = vector.extract_strided_slice %31 {offsets = [0, 32], sizes = [8, 32], strides = [1, 1]} : vector<8x128xf32> to vector<8x32xf32>
    %34 = vector.extract_strided_slice %31 {offsets = [0, 64], sizes = [8, 32], strides = [1, 1]} : vector<8x128xf32> to vector<8x32xf32>
    %35 = vector.extract_strided_slice %31 {offsets = [0, 96], sizes = [8, 32], strides = [1, 1]} : vector<8x128xf32> to vector<8x32xf32>
    %36 = arith.mulf %33, %21 : vector<8x32xf32>
    %37 = arith.mulf %32, %34 : vector<8x32xf32>
    %38 = arith.addf %36, %37 : vector<8x32xf32>
    %39 = math.tanh %38 : vector<8x32xf32>
    %40 = arith.mulf %35, %39 : vector<8x32xf32>
    %41 = arith.index_cast %23 : i32 to index
    %c0_17 = arith.constant 0 : index
    %42 = vector.load %arg14[%41, %c0_17] : memref<64x32xf32, #tpu.memory_space<vmem>>, vector<8x32xf32>
    tpu.vector_store %arg14[%41, %c0_17], %40 {strides = array<i32>} : memref<64x32xf32, #tpu.memory_space<vmem>>, vector<8x32xf32>,
    %c1_i32 = arith.constant 1 : i32
    %c8_i32_18 = arith.constant 8 : i32
    %43 = arith.muli %c1_i32, %c8_i32_18 : i32
    %44 = tpu.assume_multiple %43, 8 : i32
    %45 = arith.index_cast %44 : i32 to index
    %c0_19 = arith.constant 0 : index
    %46 = vector.load %arg13[%45, %c0_19] : memref<64x128xf32, #tpu.memory_space<vmem>>, vector<8x128xf32>
    %cst_20 = arith.constant dense<0.000000e+00> : vector<8x128xf32>
    %47 = tpu.matmul %40, %13, %cst_20 {dimension_numbers = #tpu.dot_dimension_numbers<[1], [0], [0], [1], [0, 0, 1, 1], [], []>} : vector<8x32xf32>, vector<32x128xf32>, vector<8x128xf32> -> vector<8x128xf32>
    %48 = arith.addf %46, %47 : vector<8x128xf32>
    %49 = arith.mulf %48, %8 : vector<8x128xf32>
    %50 = math.tanh %49 : vector<8x128xf32>
    %51 = arith.mulf %50, %8 : vector<8x128xf32>
    %52 = arith.addf %51, %11 : vector<8x128xf32>
    %53 = vector.extract_strided_slice %52 {offsets = [0, 0], sizes = [8, 32], strides = [1, 1]} : vector<8x128xf32> to vector<8x32xf32>
    %54 = vector.extract_strided_slice %52 {offsets = [0, 32], sizes = [8, 32], strides = [1, 1]} : vector<8x128xf32> to vector<8x32xf32>
    %55 = vector.extract_strided_slice %52 {offsets = [0, 64], sizes = [8, 32], strides = [1, 1]} : vector<8x128xf32> to vector<8x32xf32>
    %56 = vector.extract_strided_slice %52 {offsets = [0, 96], sizes = [8, 32], strides = [1, 1]} : vector<8x128xf32> to vector<8x32xf32>
    %57 = arith.mulf %54, %38 : vector<8x32xf32>
    %58 = arith.mulf %53, %55 : vector<8x32xf32>
    %59 = arith.addf %57, %58 : vector<8x32xf32>
    %60 = math.tanh %59 : vector<8x32xf32>
    %61 = arith.mulf %56, %60 : vector<8x32xf32>
    %62 = arith.index_cast %44 : i32 to index
    %c0_21 = arith.constant 0 : index
    %63 = vector.load %arg14[%62, %c0_21] : memref<64x32xf32, #tpu.memory_space<vmem>>, vector<8x32xf32>
    tpu.vector_store %arg14[%62, %c0_21], %61 {strides = array<i32>} : memref<64x32xf32, #tpu.memory_space<vmem>>, vector<8x32xf32>,
    %c2_i32 = arith.constant 2 : i32
    %c8_i32_22 = arith.constant 8 : i32
    %64 = arith.muli %c2_i32, %c8_i32_22 : i32
    %65 = tpu.assume_multiple %64, 8 : i32
    %66 = arith.index_cast %65 : i32 to index
    %c0_23 = arith.constant 0 : index
    %67 = vector.load %arg13[%66, %c0_23] : memref<64x128xf32, #tpu.memory_space<vmem>>, vector<8x128xf32>
    %cst_24 = arith.constant dense<0.000000e+00> : vector<8x128xf32>
    %68 = tpu.matmul %61, %13, %cst_24 {dimension_numbers = #tpu.dot_dimension_numbers<[1], [0], [0], [1], [0, 0, 1, 1], [], []>} : vector<8x32xf32>, vector<32x128xf32>, vector<8x128xf32> -> vector<8x128xf32>
    %69 = arith.addf %67, %68 : vector<8x128xf32>
    %70 = arith.mulf %69, %8 : vector<8x128xf32>
    %71 = math.tanh %70 : vector<8x128xf32>
    %72 = arith.mulf %71, %8 : vector<8x128xf32>
    %73 = arith.addf %72, %11 : vector<8x128xf32>
    %74 = vector.extract_strided_slice %73 {offsets = [0, 0], sizes = [8, 32], strides = [1, 1]} : vector<8x128xf32> to vector<8x32xf32>
    %75 = vector.extract_strided_slice %73 {offsets = [0, 32], sizes = [8, 32], strides = [1, 1]} : vector<8x128xf32> to vector<8x32xf32>
    %76 = vector.extract_strided_slice %73 {offsets = [0, 64], sizes = [8, 32], strides = [1, 1]} : vector<8x128xf32> to vector<8x32xf32>
    %77 = vector.extract_strided_slice %73 {offsets = [0, 96], sizes = [8, 32], strides = [1, 1]} : vector<8x128xf32> to vector<8x32xf32>
    %78 = arith.mulf %75, %59 : vector<8x32xf32>
    %79 = arith.mulf %74, %76 : vector<8x32xf32>
    %80 = arith.addf %78, %79 : vector<8x32xf32>
    %81 = math.tanh %80 : vector<8x32xf32>
    %82 = arith.mulf %77, %81 : vector<8x32xf32>
    %83 = arith.index_cast %65 : i32 to index
    %c0_25 = arith.constant 0 : index
    %84 = vector.load %arg14[%83, %c0_25] : memref<64x32xf32, #tpu.memory_space<vmem>>, vector<8x32xf32>
    tpu.vector_store %arg14[%83, %c0_25], %82 {strides = array<i32>} : memref<64x32xf32, #tpu.memory_space<vmem>>, vector<8x32xf32>,
    %c3_i32 = arith.constant 3 : i32
    %c8_i32_26 = arith.constant 8 : i32
    %85 = arith.muli %c3_i32, %c8_i32_26 : i32
    %86 = tpu.assume_multiple %85, 8 : i32
    %87 = arith.index_cast %86 : i32 to index
    %c0_27 = arith.constant 0 : index
    %88 = vector.load %arg13[%87, %c0_27] : memref<64x128xf32, #tpu.memory_space<vmem>>, vector<8x128xf32>
    %cst_28 = arith.constant dense<0.000000e+00> : vector<8x128xf32>
    %89 = tpu.matmul %82, %13, %cst_28 {dimension_numbers = #tpu.dot_dimension_numbers<[1], [0], [0], [1], [0, 0, 1, 1], [], []>} : vector<8x32xf32>, vector<32x128xf32>, vector<8x128xf32> -> vector<8x128xf32>
    %90 = arith.addf %88, %89 : vector<8x128xf32>
    %91 = arith.mulf %90, %8 : vector<8x128xf32>
    %92 = math.tanh %91 : vector<8x128xf32>
    %93 = arith.mulf %92, %8 : vector<8x128xf32>
    %94 = arith.addf %93, %11 : vector<8x128xf32>
    %95 = vector.extract_strided_slice %94 {offsets = [0, 0], sizes = [8, 32], strides = [1, 1]} : vector<8x128xf32> to vector<8x32xf32>
    %96 = vector.extract_strided_slice %94 {offsets = [0, 32], sizes = [8, 32], strides = [1, 1]} : vector<8x128xf32> to vector<8x32xf32>
    %97 = vector.extract_strided_slice %94 {offsets = [0, 64], sizes = [8, 32], strides = [1, 1]} : vector<8x128xf32> to vector<8x32xf32>
    %98 = vector.extract_strided_slice %94 {offsets = [0, 96], sizes = [8, 32], strides = [1, 1]} : vector<8x128xf32> to vector<8x32xf32>
    %99 = arith.mulf %96, %80 : vector<8x32xf32>
    %100 = arith.mulf %95, %97 : vector<8x32xf32>
    %101 = arith.addf %99, %100 : vector<8x32xf32>
    %102 = math.tanh %101 : vector<8x32xf32>
    %103 = arith.mulf %98, %102 : vector<8x32xf32>
    %104 = arith.index_cast %86 : i32 to index
    %c0_29 = arith.constant 0 : index
    %105 = vector.load %arg14[%104, %c0_29] : memref<64x32xf32, #tpu.memory_space<vmem>>, vector<8x32xf32>
    tpu.vector_store %arg14[%104, %c0_29], %103 {strides = array<i32>} : memref<64x32xf32, #tpu.memory_space<vmem>>, vector<8x32xf32>,
    %c4_i32 = arith.constant 4 : i32
    %c8_i32_30 = arith.constant 8 : i32
    %106 = arith.muli %c4_i32, %c8_i32_30 : i32
    %107 = tpu.assume_multiple %106, 8 : i32
    %108 = arith.index_cast %107 : i32 to index
    %c0_31 = arith.constant 0 : index
    %109 = vector.load %arg13[%108, %c0_31] : memref<64x128xf32, #tpu.memory_space<vmem>>, vector<8x128xf32>
    %cst_32 = arith.constant dense<0.000000e+00> : vector<8x128xf32>
    %110 = tpu.matmul %103, %13, %cst_32 {dimension_numbers = #tpu.dot_dimension_numbers<[1], [0], [0], [1], [0, 0, 1, 1], [], []>} : vector<8x32xf32>, vector<32x128xf32>, vector<8x128xf32> -> vector<8x128xf32>
    %111 = arith.addf %109, %110 : vector<8x128xf32>
    %112 = arith.mulf %111, %8 : vector<8x128xf32>
    %113 = math.tanh %112 : vector<8x128xf32>
    %114 = arith.mulf %113, %8 : vector<8x128xf32>
    %115 = arith.addf %114, %11 : vector<8x128xf32>
    %116 = vector.extract_strided_slice %115 {offsets = [0, 0], sizes = [8, 32], strides = [1, 1]} : vector<8x128xf32> to vector<8x32xf32>
    %117 = vector.extract_strided_slice %115 {offsets = [0, 32], sizes = [8, 32], strides = [1, 1]} : vector<8x128xf32> to vector<8x32xf32>
    %118 = vector.extract_strided_slice %115 {offsets = [0, 64], sizes = [8, 32], strides = [1, 1]} : vector<8x128xf32> to vector<8x32xf32>
    %119 = vector.extract_strided_slice %115 {offsets = [0, 96], sizes = [8, 32], strides = [1, 1]} : vector<8x128xf32> to vector<8x32xf32>
    %120 = arith.mulf %117, %101 : vector<8x32xf32>
    %121 = arith.mulf %116, %118 : vector<8x32xf32>
    %122 = arith.addf %120, %121 : vector<8x32xf32>
    %123 = math.tanh %122 : vector<8x32xf32>
    %124 = arith.mulf %119, %123 : vector<8x32xf32>
    %125 = arith.index_cast %107 : i32 to index
    %c0_33 = arith.constant 0 : index
    %126 = vector.load %arg14[%125, %c0_33] : memref<64x32xf32, #tpu.memory_space<vmem>>, vector<8x32xf32>
    tpu.vector_store %arg14[%125, %c0_33], %124 {strides = array<i32>} : memref<64x32xf32, #tpu.memory_space<vmem>>, vector<8x32xf32>,
    %c5_i32 = arith.constant 5 : i32
    %c8_i32_34 = arith.constant 8 : i32
    %127 = arith.muli %c5_i32, %c8_i32_34 : i32
    %128 = tpu.assume_multiple %127, 8 : i32
    %129 = arith.index_cast %128 : i32 to index
    %c0_35 = arith.constant 0 : index
    %130 = vector.load %arg13[%129, %c0_35] : memref<64x128xf32, #tpu.memory_space<vmem>>, vector<8x128xf32>
    %cst_36 = arith.constant dense<0.000000e+00> : vector<8x128xf32>
    %131 = tpu.matmul %124, %13, %cst_36 {dimension_numbers = #tpu.dot_dimension_numbers<[1], [0], [0], [1], [0, 0, 1, 1], [], []>} : vector<8x32xf32>, vector<32x128xf32>, vector<8x128xf32> -> vector<8x128xf32>
    %132 = arith.addf %130, %131 : vector<8x128xf32>
    %133 = arith.mulf %132, %8 : vector<8x128xf32>
    %134 = math.tanh %133 : vector<8x128xf32>
    %135 = arith.mulf %134, %8 : vector<8x128xf32>
    %136 = arith.addf %135, %11 : vector<8x128xf32>
    %137 = vector.extract_strided_slice %136 {offsets = [0, 0], sizes = [8, 32], strides = [1, 1]} : vector<8x128xf32> to vector<8x32xf32>
    %138 = vector.extract_strided_slice %136 {offsets = [0, 32], sizes = [8, 32], strides = [1, 1]} : vector<8x128xf32> to vector<8x32xf32>
    %139 = vector.extract_strided_slice %136 {offsets = [0, 64], sizes = [8, 32], strides = [1, 1]} : vector<8x128xf32> to vector<8x32xf32>
    %140 = vector.extract_strided_slice %136 {offsets = [0, 96], sizes = [8, 32], strides = [1, 1]} : vector<8x128xf32> to vector<8x32xf32>
    %141 = arith.mulf %138, %122 : vector<8x32xf32>
    %142 = arith.mulf %137, %139 : vector<8x32xf32>
    %143 = arith.addf %141, %142 : vector<8x32xf32>
    %144 = math.tanh %143 : vector<8x32xf32>
    %145 = arith.mulf %140, %144 : vector<8x32xf32>
    %146 = arith.index_cast %128 : i32 to index
    %c0_37 = arith.constant 0 : index
    %147 = vector.load %arg14[%146, %c0_37] : memref<64x32xf32, #tpu.memory_space<vmem>>, vector<8x32xf32>
    tpu.vector_store %arg14[%146, %c0_37], %145 {strides = array<i32>} : memref<64x32xf32, #tpu.memory_space<vmem>>, vector<8x32xf32>,
    %c6_i32 = arith.constant 6 : i32
    %c8_i32_38 = arith.constant 8 : i32
    %148 = arith.muli %c6_i32, %c8_i32_38 : i32
    %149 = tpu.assume_multiple %148, 8 : i32
    %150 = arith.index_cast %149 : i32 to index
    %c0_39 = arith.constant 0 : index
    %151 = vector.load %arg13[%150, %c0_39] : memref<64x128xf32, #tpu.memory_space<vmem>>, vector<8x128xf32>
    %cst_40 = arith.constant dense<0.000000e+00> : vector<8x128xf32>
    %152 = tpu.matmul %145, %13, %cst_40 {dimension_numbers = #tpu.dot_dimension_numbers<[1], [0], [0], [1], [0, 0, 1, 1], [], []>} : vector<8x32xf32>, vector<32x128xf32>, vector<8x128xf32> -> vector<8x128xf32>
    %153 = arith.addf %151, %152 : vector<8x128xf32>
    %154 = arith.mulf %153, %8 : vector<8x128xf32>
    %155 = math.tanh %154 : vector<8x128xf32>
    %156 = arith.mulf %155, %8 : vector<8x128xf32>
    %157 = arith.addf %156, %11 : vector<8x128xf32>
    %158 = vector.extract_strided_slice %157 {offsets = [0, 0], sizes = [8, 32], strides = [1, 1]} : vector<8x128xf32> to vector<8x32xf32>
    %159 = vector.extract_strided_slice %157 {offsets = [0, 32], sizes = [8, 32], strides = [1, 1]} : vector<8x128xf32> to vector<8x32xf32>
    %160 = vector.extract_strided_slice %157 {offsets = [0, 64], sizes = [8, 32], strides = [1, 1]} : vector<8x128xf32> to vector<8x32xf32>
    %161 = vector.extract_strided_slice %157 {offsets = [0, 96], sizes = [8, 32], strides = [1, 1]} : vector<8x128xf32> to vector<8x32xf32>
    %162 = arith.mulf %159, %143 : vector<8x32xf32>
    %163 = arith.mulf %158, %160 : vector<8x32xf32>
    %164 = arith.addf %162, %163 : vector<8x32xf32>
    %165 = math.tanh %164 : vector<8x32xf32>
    %166 = arith.mulf %161, %165 : vector<8x32xf32>
    %167 = arith.index_cast %149 : i32 to index
    %c0_41 = arith.constant 0 : index
    %168 = vector.load %arg14[%167, %c0_41] : memref<64x32xf32, #tpu.memory_space<vmem>>, vector<8x32xf32>
    tpu.vector_store %arg14[%167, %c0_41], %166 {strides = array<i32>} : memref<64x32xf32, #tpu.memory_space<vmem>>, vector<8x32xf32>,
    %c7_i32 = arith.constant 7 : i32
    %c8_i32_42 = arith.constant 8 : i32
    %169 = arith.muli %c7_i32, %c8_i32_42 : i32
    %170 = tpu.assume_multiple %169, 8 : i32
    %171 = arith.index_cast %170 : i32 to index
    %c0_43 = arith.constant 0 : index
    %172 = vector.load %arg13[%171, %c0_43] : memref<64x128xf32, #tpu.memory_space<vmem>>, vector<8x128xf32>
    %cst_44 = arith.constant dense<0.000000e+00> : vector<8x128xf32>
    %173 = tpu.matmul %166, %13, %cst_44 {dimension_numbers = #tpu.dot_dimension_numbers<[1], [0], [0], [1], [0, 0, 1, 1], [], []>} : vector<8x32xf32>, vector<32x128xf32>, vector<8x128xf32> -> vector<8x128xf32>
    %174 = arith.addf %172, %173 : vector<8x128xf32>
    %175 = arith.mulf %174, %8 : vector<8x128xf32>
    %176 = math.tanh %175 : vector<8x128xf32>
    %177 = arith.mulf %176, %8 : vector<8x128xf32>
    %178 = arith.addf %177, %11 : vector<8x128xf32>
    %179 = vector.extract_strided_slice %178 {offsets = [0, 0], sizes = [8, 32], strides = [1, 1]} : vector<8x128xf32> to vector<8x32xf32>
    %180 = vector.extract_strided_slice %178 {offsets = [0, 32], sizes = [8, 32], strides = [1, 1]} : vector<8x128xf32> to vector<8x32xf32>
    %181 = vector.extract_strided_slice %178 {offsets = [0, 64], sizes = [8, 32], strides = [1, 1]} : vector<8x128xf32> to vector<8x32xf32>
    %182 = vector.extract_strided_slice %178 {offsets = [0, 96], sizes = [8, 32], strides = [1, 1]} : vector<8x128xf32> to vector<8x32xf32>
    %183 = arith.mulf %180, %164 : vector<8x32xf32>
    %184 = arith.mulf %179, %181 : vector<8x32xf32>
    %185 = arith.addf %183, %184 : vector<8x32xf32>
    %186 = math.tanh %185 : vector<8x32xf32>
    %187 = arith.mulf %182, %186 : vector<8x32xf32>
    %188 = arith.index_cast %170 : i32 to index
    %c0_45 = arith.constant 0 : index
    %189 = vector.load %arg14[%188, %c0_45] : memref<64x32xf32, #tpu.memory_space<vmem>>, vector<8x32xf32>
    tpu.vector_store %arg14[%188, %c0_45], %187 {strides = array<i32>} : memref<64x32xf32, #tpu.memory_space<vmem>>, vector<8x32xf32>,
    %c8_i32_46 = arith.constant 8 : i32
    %c0_47 = arith.constant 0 : index
    %c0_48 = arith.constant 0 : index
    %190 = vector.load %arg3[%c0_47, %c0_48] : memref<32x128xf32, #tpu.memory_space<vmem>>, vector<32x128xf32>
    %c0_49 = arith.constant 0 : index
    %c0_50 = arith.constant 0 : index
    %191 = vector.load %arg5[%c0_49, %c0_50] : memref<32x128xf32, #tpu.memory_space<vmem>>, vector<32x128xf32>
    %c0_51 = arith.constant 0 : index
    %c0_52 = arith.constant 0 : index
    %192 = vector.load %arg7[%c0_51, %c0_52] : memref<1x128xf32, #tpu.memory_space<vmem>>, vector<1x128xf32>
    %c0_53 = arith.constant 0 : index
    %c0_54 = arith.constant 0 : index
    %193 = vector.load %arg14[%c0_53, %c0_54] : memref<64x32xf32, #tpu.memory_space<vmem>>, vector<64x32xf32>
    %cst_55 = arith.constant dense<0.000000e+00> : vector<64x128xf32>
    %194 = tpu.matmul %193, %190, %cst_55 {dimension_numbers = #tpu.dot_dimension_numbers<[1], [0], [0], [1], [0, 0, 1, 1], [], []>} : vector<64x32xf32>, vector<32x128xf32>, vector<64x128xf32> -> vector<64x128xf32>
    %195 = vector.broadcast %192 : vector<1x128xf32> to vector<64x128xf32>
    %196 = arith.addf %194, %195 : vector<64x128xf32>
    %c0_56 = arith.constant 0 : index
    %c0_57 = arith.constant 0 : index
    %197 = vector.load %arg13[%c0_56, %c0_57] : memref<64x128xf32, #tpu.memory_space<vmem>>, vector<64x128xf32>
    tpu.vector_store %arg13[%c0_56, %c0_57], %196 {strides = array<i32>} : memref<64x128xf32, #tpu.memory_space<vmem>>, vector<64x128xf32>,
    %cst_58 = arith.constant 0.000000e+00 : f32
    %198 = vector.broadcast %cst_58 : f32 to vector<8x32xf32>
    %cst_59 = arith.constant 0.000000e+00 : f32
    %199 = vector.broadcast %cst_59 : f32 to vector<8x32xf32>
    %c0_i32_60 = arith.constant 0 : i32
    %c8_i32_61 = arith.constant 8 : i32
    %200 = arith.muli %c0_i32_60, %c8_i32_61 : i32
    %201 = tpu.assume_multiple %200, 8 : i32
    %202 = arith.index_cast %201 : i32 to index
    %c0_62 = arith.constant 0 : index
    %203 = vector.load %arg13[%202, %c0_62] : memref<64x128xf32, #tpu.memory_space<vmem>>, vector<8x128xf32>
    %cst_63 = arith.constant dense<0.000000e+00> : vector<8x128xf32>
    %204 = tpu.matmul %198, %191, %cst_63 {dimension_numbers = #tpu.dot_dimension_numbers<[1], [0], [0], [1], [0, 0, 1, 1], [], []>} : vector<8x32xf32>, vector<32x128xf32>, vector<8x128xf32> -> vector<8x128xf32>
    %205 = arith.addf %203, %204 : vector<8x128xf32>
    %206 = arith.mulf %205, %8 : vector<8x128xf32>
    %207 = math.tanh %206 : vector<8x128xf32>
    %208 = arith.mulf %207, %8 : vector<8x128xf32>
    %209 = arith.addf %208, %11 : vector<8x128xf32>
    %210 = vector.extract_strided_slice %209 {offsets = [0, 0], sizes = [8, 32], strides = [1, 1]} : vector<8x128xf32> to vector<8x32xf32>
    %211 = vector.extract_strided_slice %209 {offsets = [0, 32], sizes = [8, 32], strides = [1, 1]} : vector<8x128xf32> to vector<8x32xf32>
    %212 = vector.extract_strided_slice %209 {offsets = [0, 64], sizes = [8, 32], strides = [1, 1]} : vector<8x128xf32> to vector<8x32xf32>
    %213 = vector.extract_strided_slice %209 {offsets = [0, 96], sizes = [8, 32], strides = [1, 1]} : vector<8x128xf32> to vector<8x32xf32>
    %214 = arith.mulf %211, %199 : vector<8x32xf32>
    %215 = arith.mulf %210, %212 : vector<8x32xf32>
    %216 = arith.addf %214, %215 : vector<8x32xf32>
    %217 = math.tanh %216 : vector<8x32xf32>
    %218 = arith.mulf %213, %217 : vector<8x32xf32>
    %c1_i32_64 = arith.constant 1 : i32
    %c8_i32_65 = arith.constant 8 : i32
    %219 = arith.muli %c1_i32_64, %c8_i32_65 : i32
    %220 = tpu.assume_multiple %219, 8 : i32
    %221 = arith.index_cast %220 : i32 to index
    %c0_66 = arith.constant 0 : index
    %222 = vector.load %arg13[%221, %c0_66] : memref<64x128xf32, #tpu.memory_space<vmem>>, vector<8x128xf32>
    %cst_67 = arith.constant dense<0.000000e+00> : vector<8x128xf32>
    %223 = tpu.matmul %218, %191, %cst_67 {dimension_numbers = #tpu.dot_dimension_numbers<[1], [0], [0], [1], [0, 0, 1, 1], [], []>} : vector<8x32xf32>, vector<32x128xf32>, vector<8x128xf32> -> vector<8x128xf32>
    %224 = arith.addf %222, %223 : vector<8x128xf32>
    %225 = arith.mulf %224, %8 : vector<8x128xf32>
    %226 = math.tanh %225 : vector<8x128xf32>
    %227 = arith.mulf %226, %8 : vector<8x128xf32>
    %228 = arith.addf %227, %11 : vector<8x128xf32>
    %229 = vector.extract_strided_slice %228 {offsets = [0, 0], sizes = [8, 32], strides = [1, 1]} : vector<8x128xf32> to vector<8x32xf32>
    %230 = vector.extract_strided_slice %228 {offsets = [0, 32], sizes = [8, 32], strides = [1, 1]} : vector<8x128xf32> to vector<8x32xf32>
    %231 = vector.extract_strided_slice %228 {offsets = [0, 64], sizes = [8, 32], strides = [1, 1]} : vector<8x128xf32> to vector<8x32xf32>
    %232 = vector.extract_strided_slice %228 {offsets = [0, 96], sizes = [8, 32], strides = [1, 1]} : vector<8x128xf32> to vector<8x32xf32>
    %233 = arith.mulf %230, %216 : vector<8x32xf32>
    %234 = arith.mulf %229, %231 : vector<8x32xf32>
    %235 = arith.addf %233, %234 : vector<8x32xf32>
    %236 = math.tanh %235 : vector<8x32xf32>
    %237 = arith.mulf %232, %236 : vector<8x32xf32>
    %c2_i32_68 = arith.constant 2 : i32
    %c8_i32_69 = arith.constant 8 : i32
    %238 = arith.muli %c2_i32_68, %c8_i32_69 : i32
    %239 = tpu.assume_multiple %238, 8 : i32
    %240 = arith.index_cast %239 : i32 to index
    %c0_70 = arith.constant 0 : index
    %241 = vector.load %arg13[%240, %c0_70] : memref<64x128xf32, #tpu.memory_space<vmem>>, vector<8x128xf32>
    %cst_71 = arith.constant dense<0.000000e+00> : vector<8x128xf32>
    %242 = tpu.matmul %237, %191, %cst_71 {dimension_numbers = #tpu.dot_dimension_numbers<[1], [0], [0], [1], [0, 0, 1, 1], [], []>} : vector<8x32xf32>, vector<32x128xf32>, vector<8x128xf32> -> vector<8x128xf32>
    %243 = arith.addf %241, %242 : vector<8x128xf32>
    %244 = arith.mulf %243, %8 : vector<8x128xf32>
    %245 = math.tanh %244 : vector<8x128xf32>
    %246 = arith.mulf %245, %8 : vector<8x128xf32>
    %247 = arith.addf %246, %11 : vector<8x128xf32>
    %248 = vector.extract_strided_slice %247 {offsets = [0, 0], sizes = [8, 32], strides = [1, 1]} : vector<8x128xf32> to vector<8x32xf32>
    %249 = vector.extract_strided_slice %247 {offsets = [0, 32], sizes = [8, 32], strides = [1, 1]} : vector<8x128xf32> to vector<8x32xf32>
    %250 = vector.extract_strided_slice %247 {offsets = [0, 64], sizes = [8, 32], strides = [1, 1]} : vector<8x128xf32> to vector<8x32xf32>
    %251 = vector.extract_strided_slice %247 {offsets = [0, 96], sizes = [8, 32], strides = [1, 1]} : vector<8x128xf32> to vector<8x32xf32>
    %252 = arith.mulf %249, %235 : vector<8x32xf32>
    %253 = arith.mulf %248, %250 : vector<8x32xf32>
    %254 = arith.addf %252, %253 : vector<8x32xf32>
    %255 = math.tanh %254 : vector<8x32xf32>
    %256 = arith.mulf %251, %255 : vector<8x32xf32>
    %c3_i32_72 = arith.constant 3 : i32
    %c8_i32_73 = arith.constant 8 : i32
    %257 = arith.muli %c3_i32_72, %c8_i32_73 : i32
    %258 = tpu.assume_multiple %257, 8 : i32
    %259 = arith.index_cast %258 : i32 to index
    %c0_74 = arith.constant 0 : index
    %260 = vector.load %arg13[%259, %c0_74] : memref<64x128xf32, #tpu.memory_space<vmem>>, vector<8x128xf32>
    %cst_75 = arith.constant dense<0.000000e+00> : vector<8x128xf32>
    %261 = tpu.matmul %256, %191, %cst_75 {dimension_numbers = #tpu.dot_dimension_numbers<[1], [0], [0], [1], [0, 0, 1, 1], [], []>} : vector<8x32xf32>, vector<32x128xf32>, vector<8x128xf32> -> vector<8x128xf32>
    %262 = arith.addf %260, %261 : vector<8x128xf32>
    %263 = arith.mulf %262, %8 : vector<8x128xf32>
    %264 = math.tanh %263 : vector<8x128xf32>
    %265 = arith.mulf %264, %8 : vector<8x128xf32>
    %266 = arith.addf %265, %11 : vector<8x128xf32>
    %267 = vector.extract_strided_slice %266 {offsets = [0, 0], sizes = [8, 32], strides = [1, 1]} : vector<8x128xf32> to vector<8x32xf32>
    %268 = vector.extract_strided_slice %266 {offsets = [0, 32], sizes = [8, 32], strides = [1, 1]} : vector<8x128xf32> to vector<8x32xf32>
    %269 = vector.extract_strided_slice %266 {offsets = [0, 64], sizes = [8, 32], strides = [1, 1]} : vector<8x128xf32> to vector<8x32xf32>
    %270 = vector.extract_strided_slice %266 {offsets = [0, 96], sizes = [8, 32], strides = [1, 1]} : vector<8x128xf32> to vector<8x32xf32>
    %271 = arith.mulf %268, %254 : vector<8x32xf32>
    %272 = arith.mulf %267, %269 : vector<8x32xf32>
    %273 = arith.addf %271, %272 : vector<8x32xf32>
    %274 = math.tanh %273 : vector<8x32xf32>
    %275 = arith.mulf %270, %274 : vector<8x32xf32>
    %c4_i32_76 = arith.constant 4 : i32
    %c8_i32_77 = arith.constant 8 : i32
    %276 = arith.muli %c4_i32_76, %c8_i32_77 : i32
    %277 = tpu.assume_multiple %276, 8 : i32
    %278 = arith.index_cast %277 : i32 to index
    %c0_78 = arith.constant 0 : index
    %279 = vector.load %arg13[%278, %c0_78] : memref<64x128xf32, #tpu.memory_space<vmem>>, vector<8x128xf32>
    %cst_79 = arith.constant dense<0.000000e+00> : vector<8x128xf32>
    %280 = tpu.matmul %275, %191, %cst_79 {dimension_numbers = #tpu.dot_dimension_numbers<[1], [0], [0], [1], [0, 0, 1, 1], [], []>} : vector<8x32xf32>, vector<32x128xf32>, vector<8x128xf32> -> vector<8x128xf32>
    %281 = arith.addf %279, %280 : vector<8x128xf32>
    %282 = arith.mulf %281, %8 : vector<8x128xf32>
    %283 = math.tanh %282 : vector<8x128xf32>
    %284 = arith.mulf %283, %8 : vector<8x128xf32>
    %285 = arith.addf %284, %11 : vector<8x128xf32>
    %286 = vector.extract_strided_slice %285 {offsets = [0, 0], sizes = [8, 32], strides = [1, 1]} : vector<8x128xf32> to vector<8x32xf32>
    %287 = vector.extract_strided_slice %285 {offsets = [0, 32], sizes = [8, 32], strides = [1, 1]} : vector<8x128xf32> to vector<8x32xf32>
    %288 = vector.extract_strided_slice %285 {offsets = [0, 64], sizes = [8, 32], strides = [1, 1]} : vector<8x128xf32> to vector<8x32xf32>
    %289 = vector.extract_strided_slice %285 {offsets = [0, 96], sizes = [8, 32], strides = [1, 1]} : vector<8x128xf32> to vector<8x32xf32>
    %290 = arith.mulf %287, %273 : vector<8x32xf32>
    %291 = arith.mulf %286, %288 : vector<8x32xf32>
    %292 = arith.addf %290, %291 : vector<8x32xf32>
    %293 = math.tanh %292 : vector<8x32xf32>
    %294 = arith.mulf %289, %293 : vector<8x32xf32>
    %c5_i32_80 = arith.constant 5 : i32
    %c8_i32_81 = arith.constant 8 : i32
    %295 = arith.muli %c5_i32_80, %c8_i32_81 : i32
    %296 = tpu.assume_multiple %295, 8 : i32
    %297 = arith.index_cast %296 : i32 to index
    %c0_82 = arith.constant 0 : index
    %298 = vector.load %arg13[%297, %c0_82] : memref<64x128xf32, #tpu.memory_space<vmem>>, vector<8x128xf32>
    %cst_83 = arith.constant dense<0.000000e+00> : vector<8x128xf32>
    %299 = tpu.matmul %294, %191, %cst_83 {dimension_numbers = #tpu.dot_dimension_numbers<[1], [0], [0], [1], [0, 0, 1, 1], [], []>} : vector<8x32xf32>, vector<32x128xf32>, vector<8x128xf32> -> vector<8x128xf32>
    %300 = arith.addf %298, %299 : vector<8x128xf32>
    %301 = arith.mulf %300, %8 : vector<8x128xf32>
    %302 = math.tanh %301 : vector<8x128xf32>
    %303 = arith.mulf %302, %8 : vector<8x128xf32>
    %304 = arith.addf %303, %11 : vector<8x128xf32>
    %305 = vector.extract_strided_slice %304 {offsets = [0, 0], sizes = [8, 32], strides = [1, 1]} : vector<8x128xf32> to vector<8x32xf32>
    %306 = vector.extract_strided_slice %304 {offsets = [0, 32], sizes = [8, 32], strides = [1, 1]} : vector<8x128xf32> to vector<8x32xf32>
    %307 = vector.extract_strided_slice %304 {offsets = [0, 64], sizes = [8, 32], strides = [1, 1]} : vector<8x128xf32> to vector<8x32xf32>
    %308 = vector.extract_strided_slice %304 {offsets = [0, 96], sizes = [8, 32], strides = [1, 1]} : vector<8x128xf32> to vector<8x32xf32>
    %309 = arith.mulf %306, %292 : vector<8x32xf32>
    %310 = arith.mulf %305, %307 : vector<8x32xf32>
    %311 = arith.addf %309, %310 : vector<8x32xf32>
    %312 = math.tanh %311 : vector<8x32xf32>
    %313 = arith.mulf %308, %312 : vector<8x32xf32>
    %c6_i32_84 = arith.constant 6 : i32
    %c8_i32_85 = arith.constant 8 : i32
    %314 = arith.muli %c6_i32_84, %c8_i32_85 : i32
    %315 = tpu.assume_multiple %314, 8 : i32
    %316 = arith.index_cast %315 : i32 to index
    %c0_86 = arith.constant 0 : index
    %317 = vector.load %arg13[%316, %c0_86] : memref<64x128xf32, #tpu.memory_space<vmem>>, vector<8x128xf32>
    %cst_87 = arith.constant dense<0.000000e+00> : vector<8x128xf32>
    %318 = tpu.matmul %313, %191, %cst_87 {dimension_numbers = #tpu.dot_dimension_numbers<[1], [0], [0], [1], [0, 0, 1, 1], [], []>} : vector<8x32xf32>, vector<32x128xf32>, vector<8x128xf32> -> vector<8x128xf32>
    %319 = arith.addf %317, %318 : vector<8x128xf32>
    %320 = arith.mulf %319, %8 : vector<8x128xf32>
    %321 = math.tanh %320 : vector<8x128xf32>
    %322 = arith.mulf %321, %8 : vector<8x128xf32>
    %323 = arith.addf %322, %11 : vector<8x128xf32>
    %324 = vector.extract_strided_slice %323 {offsets = [0, 0], sizes = [8, 32], strides = [1, 1]} : vector<8x128xf32> to vector<8x32xf32>
    %325 = vector.extract_strided_slice %323 {offsets = [0, 32], sizes = [8, 32], strides = [1, 1]} : vector<8x128xf32> to vector<8x32xf32>
    %326 = vector.extract_strided_slice %323 {offsets = [0, 64], sizes = [8, 32], strides = [1, 1]} : vector<8x128xf32> to vector<8x32xf32>
    %327 = vector.extract_strided_slice %323 {offsets = [0, 96], sizes = [8, 32], strides = [1, 1]} : vector<8x128xf32> to vector<8x32xf32>
    %328 = arith.mulf %325, %311 : vector<8x32xf32>
    %329 = arith.mulf %324, %326 : vector<8x32xf32>
    %330 = arith.addf %328, %329 : vector<8x32xf32>
    %331 = math.tanh %330 : vector<8x32xf32>
    %332 = arith.mulf %327, %331 : vector<8x32xf32>
    %c7_i32_88 = arith.constant 7 : i32
    %c8_i32_89 = arith.constant 8 : i32
    %333 = arith.muli %c7_i32_88, %c8_i32_89 : i32
    %334 = tpu.assume_multiple %333, 8 : i32
    %335 = arith.index_cast %334 : i32 to index
    %c0_90 = arith.constant 0 : index
    %336 = vector.load %arg13[%335, %c0_90] : memref<64x128xf32, #tpu.memory_space<vmem>>, vector<8x128xf32>
    %cst_91 = arith.constant dense<0.000000e+00> : vector<8x128xf32>
    %337 = tpu.matmul %332, %191, %cst_91 {dimension_numbers = #tpu.dot_dimension_numbers<[1], [0], [0], [1], [0, 0, 1, 1], [], []>} : vector<8x32xf32>, vector<32x128xf32>, vector<8x128xf32> -> vector<8x128xf32>
    %338 = arith.addf %336, %337 : vector<8x128xf32>
    %339 = arith.mulf %338, %8 : vector<8x128xf32>
    %340 = math.tanh %339 : vector<8x128xf32>
    %341 = arith.mulf %340, %8 : vector<8x128xf32>
    %342 = arith.addf %341, %11 : vector<8x128xf32>
    %343 = vector.extract_strided_slice %342 {offsets = [0, 0], sizes = [8, 32], strides = [1, 1]} : vector<8x128xf32> to vector<8x32xf32>
    %344 = vector.extract_strided_slice %342 {offsets = [0, 32], sizes = [8, 32], strides = [1, 1]} : vector<8x128xf32> to vector<8x32xf32>
    %345 = vector.extract_strided_slice %342 {offsets = [0, 64], sizes = [8, 32], strides = [1, 1]} : vector<8x128xf32> to vector<8x32xf32>
    %346 = vector.extract_strided_slice %342 {offsets = [0, 96], sizes = [8, 32], strides = [1, 1]} : vector<8x128xf32> to vector<8x32xf32>
    %347 = arith.mulf %344, %330 : vector<8x32xf32>
    %348 = arith.mulf %343, %345 : vector<8x32xf32>
    %349 = arith.addf %347, %348 : vector<8x32xf32>
    %350 = math.tanh %349 : vector<8x32xf32>
    %351 = arith.mulf %346, %350 : vector<8x32xf32>
    %c8_i32_92 = arith.constant 8 : i32
    %c0_93 = arith.constant 0 : index
    %c0_94 = arith.constant 0 : index
    %352 = vector.load %arg8[%c0_93, %c0_94] : memref<32x128xf32, #tpu.memory_space<vmem>>, vector<32x128xf32>
    %c0_95 = arith.constant 0 : index
    %c0_96 = arith.constant 0 : index
    %353 = vector.load %arg9[%c0_95, %c0_96] : memref<1x128xf32, #tpu.memory_space<vmem>>, vector<1x128xf32>
    %c0_97 = arith.constant 0 : index
    %c0_98 = arith.constant 0 : index
    %354 = vector.load %arg10[%c0_97, %c0_98] : memref<128x128xf32, #tpu.memory_space<vmem>>, vector<128x128xf32>
    %c0_99 = arith.constant 0 : index
    %c0_100 = arith.constant 0 : index
    %355 = vector.load %arg11[%c0_99, %c0_100] : memref<1x128xf32, #tpu.memory_space<vmem>>, vector<1x128xf32>
    %cst_101 = arith.constant dense<0.000000e+00> : vector<8x128xf32>
    %356 = tpu.matmul %351, %352, %cst_101 {dimension_numbers = #tpu.dot_dimension_numbers<[1], [0], [0], [1], [0, 0, 1, 1], [], []>} : vector<8x32xf32>, vector<32x128xf32>, vector<8x128xf32> -> vector<8x128xf32>
    %357 = vector.broadcast %353 : vector<1x128xf32> to vector<8x128xf32>
    %358 = arith.addf %356, %357 : vector<8x128xf32>
    %cst_102 = arith.constant 0.000000e+00 : f32
    %359 = vector.broadcast %cst_102 : f32 to vector<8x128xf32>
    %360 = arith.maximumf %358, %359 : vector<8x128xf32>
    %cst_103 = arith.constant dense<0.000000e+00> : vector<8x128xf32>
    %361 = tpu.matmul %360, %354, %cst_103 {dimension_numbers = #tpu.dot_dimension_numbers<[1], [0], [0], [1], [0, 0, 1, 1], [], []>} : vector<8x128xf32>, vector<128x128xf32>, vector<8x128xf32> -> vector<8x128xf32>
    %362 = vector.broadcast %355 : vector<1x128xf32> to vector<8x128xf32>
    %363 = arith.addf %361, %362 : vector<8x128xf32>
    %c0_104 = arith.constant 0 : index
    %c0_105 = arith.constant 0 : index
    %364 = vector.load %arg12[%c0_104, %c0_105] : memref<8x128xf32, #tpu.memory_space<vmem>>, vector<8x128xf32>
    tpu.vector_store %arg12[%c0_104, %c0_105], %363 {strides = array<i32>} : memref<8x128xf32, #tpu.memory_space<vmem>>, vector<8x128xf32>,
    return
  }
  func.func @transform_0(%arg0: i32) -> (i32, i32) {
    %c0_i32 = arith.constant 0 : i32
    %c0_i32_0 = arith.constant 0 : i32
    %c0_i32_1 = arith.constant 0 : i32
    return %c0_i32, %c0_i32_0 : i32, i32
  }
  func.func @transform_1(%arg0: i32) -> (i32, i32) {
    %c0_i32 = arith.constant 0 : i32
    %c0_i32_0 = arith.constant 0 : i32
    %c0_i32_1 = arith.constant 0 : i32
    return %c0_i32, %c0_i32_0 : i32, i32
  }
  func.func @transform_2(%arg0: i32) -> (i32, i32) {
    %c0_i32 = arith.constant 0 : i32
    %c0_i32_0 = arith.constant 0 : i32
    %c0_i32_1 = arith.constant 0 : i32
    return %c0_i32, %c0_i32_0 : i32, i32
  }
  func.func @transform_3(%arg0: i32) -> (i32, i32) {
    %c0_i32 = arith.constant 0 : i32
    %c0_i32_0 = arith.constant 0 : i32
    %c0_i32_1 = arith.constant 0 : i32
    return %c0_i32, %c0_i32_0 : i32, i32
  }
  func.func @transform_4(%arg0: i32) -> (i32, i32) {
    %c0_i32 = arith.constant 0 : i32
    %c0_i32_0 = arith.constant 0 : i32
    %c0_i32_1 = arith.constant 0 : i32
    return %c0_i32, %c0_i32_0 : i32, i32
  }
  func.func @transform_5(%arg0: i32) -> (i32, i32) {
    %c0_i32 = arith.constant 0 : i32
    %c0_i32_0 = arith.constant 0 : i32
    %c0_i32_1 = arith.constant 0 : i32
    return %c0_i32, %c0_i32_0 : i32, i32
  }
  func.func @transform_6(%arg0: i32) -> (i32, i32) {
    %c0_i32 = arith.constant 0 : i32
    %c0_i32_0 = arith.constant 0 : i32
    %c0_i32_1 = arith.constant 0 : i32
    return %c0_i32, %c0_i32_0 : i32, i32
  }
  func.func @transform_7(%arg0: i32) -> (i32, i32) {
    %c0_i32 = arith.constant 0 : i32
    %c0_i32_0 = arith.constant 0 : i32
    %c0_i32_1 = arith.constant 0 : i32
    return %c0_i32, %c0_i32_0 : i32, i32
  }
  func.func @transform_8(%arg0: i32) -> (i32, i32) {
    %c0_i32 = arith.constant 0 : i32
    %c0_i32_0 = arith.constant 0 : i32
    %c0_i32_1 = arith.constant 0 : i32
    return %c0_i32, %c0_i32_0 : i32, i32
  }
  func.func @transform_9(%arg0: i32) -> (i32, i32) {
    %c0_i32 = arith.constant 0 : i32
    %c0_i32_0 = arith.constant 0 : i32
    %c0_i32_1 = arith.constant 0 : i32
    return %c0_i32, %c0_i32_0 : i32, i32
  }
  func.func @transform_10(%arg0: i32) -> (i32, i32) {
    %c0_i32 = arith.constant 0 : i32
    %c0_i32_0 = arith.constant 0 : i32
    %c0_i32_1 = arith.constant 0 : i32
    return %c0_i32, %c0_i32_0 : i32, i32
  }
  func.func @transform_11(%arg0: i32) -> (i32, i32) {
    %c0_i32 = arith.constant 0 : i32
    %c0_i32_0 = arith.constant 0 : i32
    %c0_i32_1 = arith.constant 0 : i32
    return %c0_i32, %c0_i32_0 : i32, i32
  }
}

</mosaic_0001>

<bundles_post_ra>
// kernel: tpu_custom_call.1
= control target key start
LH: loop header
LB: loop body
LE: loop exit
PB: predicated region body
PF: predicated region fallthrough
CT: control target
= control target key end

     0   :  { %16 = vsyncpa [#allocation5], 0  ;;  %s3326_s0 = inlined_call_operand.vmem [shape: f32[64,16], index: 0, kind: input, shape index: {}]   ;;  %s3327_s1 = inlined_call_operand.vmem [shape: f32[16,128], index: 1, kind: input, shape index: {}]   ;;  %s3328_s2 = inlined_call_operand.vmem [shape: f32[32,128], index: 2, kind: input, shape index: {}]   ;;  %s3329_s3 = inlined_call_operand.vmem [shape: f32[32,128], index: 3, kind: input, shape index: {}]   ;;  %s3330_s4 = inlined_call_operand.hbm [shape: f32[32,128], index: 4, kind: input, shape index: {}]   ;;  %s3331_s5 = inlined_call_operand.vmem [shape: f32[1,128], index: 5, kind: input, shape index: {}]   ;;  %s3332_s6 = inlined_call_operand.vmem [shape: f32[1,128], index: 6, kind: input, shape index: {}]   ;;  %s3333_s7 = inlined_call_operand.hbm [shape: f32[32,128], index: 7, kind: input, shape index: {}]   ;;  %s3334_s8 = inlined_call_operand.vmem [shape: f32[1,128], index: 8, kind: input, shape index: {}]   ;;  %s3335_s9 = inlined_call_operand.hbm [shape: f32[128,128], index: 9, kind: input, shape index: {}]   ;;  %s3336_s10 = inlined_call_operand.vmem [shape: f32[1,128], index: 10, kind: input, shape index: {}]   ;;  %s3337_s11 = inlined_call_operand.hbm [shape: f32[8,128], index: 11, kind: output, shape index: {}]  }
   0x1   :  { %17 = vsyncpa [#allocation8], 0 }
   0x2   :  { %18 = vsyncpa [#allocation6], 0  ;;  %s2776_s17 = smov [#allocation7]   ;;  %s2777_s19 = smov [#allocation4]  }
   0x3   :  { %s48_s18 = sshll.u32 %s2776_s17, 4  ;;  %s32_s20 = sshll.u32 %s2777_s19, 4  ;;  %s49_s18 = int_to_ptr.vmem [resolvable:$true] %s48_s18  ;;  %s33_s20 = int_to_ptr.vmem [resolvable:$true] %s32_s20 }
   0x4   :  { %s2698_s21 = scalar_lea.vmem %s49_s18, 512  ;;  %p2703_p1 = scmp.lt.s32.totalorder %s49_s18, %s49_s18 }
   0x5   :  { %p2699_p0 = scmp.ne.s32.totalorder %s49_s18, %s2698_s21  ;;  %p2704_p2 = scmp.lt.s32.totalorder %s2698_s21, %s2698_s21 }
   0x7   :  { %p2705_p3 = por %p2704_p2, %p2703_p1 }
   0x9   :  { %p2706_p4 = pnand %p2705_p3, %p2699_p0 }
   0xb   :  { %2709 = shalt.err (!%p2706_p4)
}
   0xc   :  { %s2778_s22 = smov 128   ;;  %s2779_s23 = smov 8  }
   0xd   :  { %54 = dma.hbm_to_vmem [thread:$0]  %s3333_s7, 512, %s49_s18, [#allocation8], %s2778_s22, %s2778_s22, %s2779_s23  }
   0xe   :  { %s2718_s26 = scalar_lea.vmem %s33_s20, 512  ;;  %p2723_p6 = scmp.lt.s32.totalorder %s33_s20, %s33_s20 }
   0xf   :  { %p2719_p5 = scmp.ne.s32.totalorder %s33_s20, %s2718_s26  ;;  %p2724_p7 = scmp.lt.s32.totalorder %s2718_s26, %s2718_s26 }
  0x11   :  { %p2725_p8 = por %p2724_p7, %p2723_p6 }
  0x13   :  { %p2726_p9 = pnand %p2725_p8, %p2719_p5 }
  0x15   :  { %2729 = shalt.err (!%p2726_p9)
}
  0x16   :  { %38 = dma.hbm_to_vmem [thread:$0]  %s3330_s4, 512, %s33_s20, [#allocation5], %s2778_s22, %s2778_s22, %s2779_s23  }
  0x17   :  { %s2780_s29 = smov [#allocation9]  }
  0x18   :  { %s62_s30 = sshll.u32 %s2780_s29, 4  ;;  %s63_s30 = int_to_ptr.vmem [resolvable:$true] %s62_s30 }
  0x19   :  { %s2738_s12 = scalar_lea.vmem %s63_s30, 2048  ;;  %p2743_p11 = scmp.lt.s32.totalorder %s63_s30, %s63_s30 }
  0x1a   :  { %p2739_p10 = scmp.ne.s32.totalorder %s63_s30, %s2738_s12  ;;  %p2744_p12 = scmp.lt.s32.totalorder %s2738_s12, %s2738_s12 }
  0x1c   :  { %p2745_p13 = por %p2744_p12, %p2743_p11 }
  0x1e   :  { %p2746_p0 = pnand %p2745_p13, %p2739_p10 }
  0x20   :  { %2749 = shalt.err (!%p2746_p0)
}
  0x21   :  { %68 = dma.hbm_to_vmem [thread:$0]  %s3335_s9, 2048, %s63_s30, [#allocation8], %s2778_s22, %s2778_s22, %s2779_s23  }
  0x22   :  { %2770 = dma.done.wait [#allocation5], 512  }
  0x23   :  { %2771 = vsyncadd [#allocation5], 4294966784 }
  0x24   :  { %2772 = dma.done.wait [#allocation8], 2560  }
  0x25   :  { %2773 = vsyncadd [#allocation8], 4294964736  ;;  %v2781_v0 = vmov 0.0   ;;  %vm2782_vm0 = vmmov 0   ;;  %vm108_vm1 = vcmask 130048   ;;  %v88_v1 = vld [vmem:[%s3327_s1 + $0x8] sm:$0xff]  ;;  %v80_v19 = vlaneseq }
  0x26   :  { %2406 = vmatprep.subr.mxu1 %v2781_v0  ;;  %2414 = vmatprep.mubr.msk.f32.mxu1 %vm2782_vm0, %v2781_v0  ;;  %v87_v2 = vld [vmem:[%s3327_s1] sm:$0xff]  ;;  %v2872_v4 = vld [vmem:[%s3329_s3 + $0x18] sm:$0xff]  ;;  %v95_v5 = vld [vmem:[%s3326_s0 + $0x8] sm:$0xff]  ;;  %v2783_v34 = vmov 0.5   ;;  %s2785_s17 = smov 32   ;;  %vm247_vm5 = vcmask 261120  }
  0x27   :  { %v94_v3 = vld [vmem:[%s3326_s0] sm:$0xff]  ;;  %2357 = vmatprep.subr.mxu0 %v88_v1  ;;  %2407 = vmatpush3.msra.mxu1 %v2872_v4  ;;  %v96_v6 = vld [vmem:[%s3326_s0 + $0x10] sm:$0xff]  ;;  %v97_v8 = vld [vmem:[%s3326_s0 + $0x18] sm:$0xff]  ;;  %v81_v23 = vand.u32 127, %v80_v19  ;;  %s2786_s29 = smov [#allocation10]  }
  0x28   :  { %2361 = vmatprep.mubr.msk.f32.mxu0 %vm108_vm1, %v94_v3  ;;  %2358 = vmatpush3.msra.mxu0 %v88_v1  ;;  %v2884_v7 = vld [vmem:[%s3329_s3 + $0x10] sm:$0xff]  ;;  %v98_v9 = vld [vmem:[%s3326_s0 + $0x20] sm:$0xff]  ;;  %v2902_v10 = vld [vmem:[%s3329_s3 + $0x8] sm:$0xff]  ;;  %s2188_s30 = sshll.u32 %s2786_s29, 4  ;;  %s2189_s30 = int_to_ptr.vmem [resolvable:$true] %s2188_s30 }
  0x29   :  { %2359 = vmatprep.subr.mxu0 %v87_v2  ;;  %2408 = vmatprep.subr.mxu1 %v2781_v0  ;;  %v2912_v11 = vld [vmem:[%s3329_s3] sm:$0xff]  ;;  %v99_v12 = vld [vmem:[%s3326_s0 + $0x28] sm:$0xff]  ;;  %v100_v13 = vld [vmem:[%s3326_s0 + $0x30] sm:$0xff]  ;;  %vm82_vm2 = vcmp.ge.s32.totalorder %v81_v23, 64  ;;  %vm83_vm3 = vcmp.lt.s32.totalorder %v81_v23, 96  ;;  %s2750_s12 = scalar_lea.vmem %s2189_s30, 128  ;;  %p2755_p2 = scmp.lt.s32.totalorder %s2189_s30, %s2189_s30 }
  0x2a   :  { %2360 = vmatpush3.msra.mxu0 %v87_v2  ;;  %2409 = vmatpush3.msra.mxu1 %v2884_v7  ;;  %v101_v14 = vld [vmem:[%s3326_s0 + $0x38] sm:$0xff]  ;;  %v2198_v15 = vld [vmem:[%s3331_s5] ss:$0 sm:$0xff]  ;;  %vm84_vm4 = vmand %vm82_vm2, %vm83_vm3  ;;  %s2784_s5 = smov 64   ;;  %p2751_p1 = scmp.ne.s32.totalorder %s2189_s30, %s2750_s12 }
  0x2b   :  { %2362 = vmatmul.mubr.msk.f32.vlgmr.msra.gmra.mxu0 %vm108_vm1, %v95_v5  ;;  %2373 = vmatprep.subr.mxu0 %v2781_v0  ;;  %v2962_v35 = vsel %vm84_vm4, 1.0, %v2783_v34  ;;  %v2965_v41 = vsel %vm84_vm4, 0.0, %v2783_v34  ;;  %p2756_p3 = scmp.lt.s32.totalorder %s2750_s12, %s2750_s12 }
  0x2c   :  { %2374 = vmatpush3.msra.mxu0 %v2872_v4  ;;  %2364 = vmatprep.mubr.msk.f32.mxu0 %vm108_vm1, %v96_v6 }
  0x2d   :  { %2375 = vmatprep.subr.mxu0 %v2781_v0  ;;  %2410 = vmatprep.subr.mxu1 %v2781_v0  ;;  %p2757_p4 = por %p2756_p3, %p2755_p2 }
  0x2e   :  { %2376 = vmatpush3.msra.mxu0 %v2884_v7  ;;  %2411 = vmatpush3.msra.mxu1 %v2902_v10 }
  0x2f   :  { %2365 = vmatmul.mubr.msk.f32.gmra.mxu0 %vm108_vm1, %v97_v8  ;;  %2377 = vmatprep.subr.mxu0 %v2781_v0  ;;  %p2758_p5 = pnand %p2757_p4, %p2751_p1 }
  0x30   :  { %2367 = vmatprep.mubr.msk.f32.mxu0 %vm108_vm1, %v98_v9  ;;  %2378 = vmatpush3.msra.mxu0 %v2902_v10 }
  0x31   :  { %2379 = vmatprep.subr.mxu0 %v2781_v0  ;;  %2412 = vmatprep.subr.mxu1 %v2781_v0 }
  0x32   :  { %2380 = vmatpush3.msra.mxu0 %v2912_v11  ;;  %2413 = vmatpush3.msra.mxu1 %v2912_v11 }
  0x33   :  { %2368 = vmatmul.mubr.msk.f32.gmra.mxu0 %vm108_vm1, %v99_v12  ;;  %2384 = vmatprep.subr.mxu0 %v2781_v0 }
  0x34   :  { %2370 = vmatprep.mubr.msk.f32.mxu0 %vm108_vm1, %v100_v13  ;;  %2428 = vmatprep.subr.mxu1 %v2781_v0 }
  0x37   :  { %2371 = vmatmul.mubr.msk.f32.gmra.mxu0 %vm108_vm1, %v101_v14 }
  0x38   :  { %2381 = vmatprep.mubr.msk.f32.mxu0 %vm2782_vm0, %v2781_v0 }
  0x3b   :  { %2382 = vmatmul.mubr.f32.vlgmr.msra.gmra.mxu0 %v2781_v0 }
  0x3c   :  { %2385 = vmatpush3.msra.mxu0 %v2872_v4  ;;  %2392 = vmatprep.mubr.msk.f32.mxu0 %vm2782_vm0, %v2781_v0 }
  0x3d   :  { %2386 = vmatprep.subr.mxu0 %v2781_v0 }
  0x3e   :  { %2387 = vmatpush3.msra.mxu0 %v2884_v7 }
  0x3f   :  { %2388 = vmatprep.subr.mxu0 %v2781_v0 }
  0x40   :  { %2389 = vmatpush3.msra.mxu0 %v2902_v10 }
  0x41   :  { %2390 = vmatprep.subr.mxu0 %v2781_v0 }
  0x42   :  { %2391 = vmatpush3.msra.mxu0 %v2912_v11 }
  0x43   :  { %2395 = vmatprep.subr.mxu0 %v2781_v0 }
  0xeb   :  { %v2363_v16 = vpop.f32.mrf.mxu0 }
  0xec   :  { %v205_v17 = vadd.f32 %v2363_v16, %v2198_v15 }
  0xed   :  { %v199_v18 = vpop.f32.mrf.mxu0 }
  0xee   :  { %v200_v32 = vadd.f32 %v2198_v15, %v199_v18 }
  0xef   :  { %v2366_v20 = vpop.f32.mrf.mxu0 }
  0xf0   :  { %v2950_v21 = vadd.f32 %v2366_v20, %v2198_v15 }
  0xf1   :  { %v209_v22 = vpop.f32.mrf.mxu0 }
  0xf2   :  { %v2952_v24 = vadd.f32 %v2198_v15, %v209_v22 }
  0xf3   :  { %v2369_v25 = vpop.f32.mrf.mxu0 }
  0xf4   :  { %v2954_v26 = vadd.f32 %v2369_v25, %v2198_v15 }
  0xf5   :  { %v219_v27 = vpop.f32.mrf.mxu0 }
  0xf6   :  { %v2956_v28 = vadd.f32 %v2198_v15, %v219_v27 }
  0xf7   :  { %v2372_v29 = vpop.f32.mrf.mxu0 }
  0xf8   :  { %v2958_v30 = vadd.f32 %v2372_v29, %v2198_v15 }
  0xf9   :  { %v229_v31 = vpop.f32.mrf.mxu0 }
  0xfa   :  { %v2960_v33 = vadd.f32 %v2198_v15, %v229_v31 }
  0xfb   :  { %v317_v36 = vpop.f32.mrf.mxu0 }
  0xfc   :  { %v321_v37 = vadd.f32 %v317_v36, %v200_v32 }
  0xfd   :  { %v2383_v38 = vpop.f32.mrf.mxu0 }
  0xfe   :  { %v322_v39 = vmul.f32 %v321_v37, %v2962_v35 }
 0x100   :  { %2626 = vtanh.f32 %v322_v39 }
 0x10d   :  { %v2627_v40 = vpop.eup %2626 }
 0x10e   :  { %v324_v42 = vmul.f32 %v2627_v40, %v2962_v35 }
 0x110   :  { %v325_v43 = vadd.f32 %v324_v42, %v2965_v41 }
 0x112   :  { %328 = vrot.lane.b32.xlu0 %v325_v43, %s2784_s5  ;;  %v326_v46 = vmul.f32 0.0, %v325_v43 }
 0x184   :  { %v329_v44 = vpop.permute.xlu0 %328 }
 0x185   :  { %v331_v45 = vmul.f32 %v329_v44, %v325_v43 }
 0x187   :  { %333 = vrot.lane.b32.xlu0 %v331_v45, %s2785_s17 }
 0x1f9   :  { %v334_v47 = vpop.permute.xlu0 %333 }
 0x1fa   :  { %v336_v48 = vadd.f32 %v334_v47, %v326_v46 }
 0x1fc   :  { %2628 = vtanh.f32 %v336_v48 }
 0x209   :  { %v2629_v49 = vpop.eup %2628 }
 0x20a   :  { %339 = vrot.lane.b32.xlu1 %v2629_v49, %s2784_s5 }
 0x27c   :  { %v340_v50 = vpop.permute.xlu1 %339 }
 0x27d   :  { %v342_v51 = vmul.f32 %v340_v50, %v325_v43 }
 0x27f   :  { %344 = vrot.lane.b32.xlu1 %v342_v51, %s2785_s17 }
 0x2f1   :  { %v345_v52 = vpop.permute.xlu1 %344 }
 0x2f2   :  { %347 = vst.msk [vmem:[#allocation3] sm:$0xff] %vm247_vm5, %v345_v52  ;;  %2393 = vmatmul.mubr.msk.f32.vlgmr.msra.gmra.mxu0 %vm247_vm5, %v345_v52 }
 0x2f3   :  { %2396 = vmatpush3.msra.mxu0 %v2872_v4  ;;  %2403 = vmatprep.mubr.msk.f32.mxu0 %vm2782_vm0, %v2781_v0 }
 0x2f4   :  { %2397 = vmatprep.subr.mxu0 %v2781_v0 }
 0x2f5   :  { %2398 = vmatpush3.msra.mxu0 %v2884_v7 }
 0x2f6   :  { %2399 = vmatprep.subr.mxu0 %v2781_v0 }
 0x2f7   :  { %2400 = vmatpush3.msra.mxu0 %v2902_v10 }
 0x2f8   :  { %2401 = vmatprep.subr.mxu0 %v2781_v0 }
 0x2f9   :  { %2402 = vmatpush3.msra.mxu0 %v2912_v11 }
 0x2fa   :  { %2417 = vmatprep.subr.mxu0 %v2781_v0 }
 0x3b2   :  { %v418_v53 = vpop.f32.mrf.mxu0 }
 0x3b3   :  { %v422_v54 = vadd.f32 %v418_v53, %v205_v17 }
 0x3b4   :  { %v2394_v55 = vpop.f32.mrf.mxu0 }
 0x3b5   :  { %v423_v56 = vmul.f32 %v422_v54, %v2962_v35 }
 0x3b7   :  { %2630 = vtanh.f32 %v423_v56 }
 0x3c4   :  { %v2631_v57 = vpop.eup %2630 }
 0x3c5   :  { %v425_v58 = vmul.f32 %v2631_v57, %v2962_v35 }
 0x3c7   :  { %v426_v59 = vadd.f32 %v425_v58, %v2965_v41 }
 0x3c9   :  { %429 = vrot.lane.b32.xlu0 %v426_v59, %s2784_s5  ;;  %v427_v62 = vmul.f32 %v426_v59, %v336_v48 }
 0x43b   :  { %v430_v60 = vpop.permute.xlu0 %429 }
 0x43c   :  { %v432_v61 = vmul.f32 %v430_v60, %v426_v59 }
 0x43e   :  { %434 = vrot.lane.b32.xlu1 %v432_v61, %s2785_s17 }
 0x4b0   :  { %v435_v63 = vpop.permute.xlu1 %434 }
 0x4b1   :  { %v437_v1 = vadd.f32 %v435_v63, %v427_v62 }
 0x4b3   :  { %2632 = vtanh.f32 %v437_v1 }
 0x4c0   :  { %v2633_v2 = vpop.eup %2632 }
 0x4c1   :  { %440 = vrot.lane.b32.xlu0 %v2633_v2, %s2784_s5 }
 0x533   :  { %v441_v3 = vpop.permute.xlu0 %440 }
 0x534   :  { %v443_v5 = vmul.f32 %v441_v3, %v426_v59 }
 0x536   :  { %445 = vrot.lane.b32.xlu1 %v443_v5, %s2785_s17 }
 0x5a8   :  { %v446_v6 = vpop.permute.xlu1 %445 }
 0x5a9   :  { %449 = vst.msk [vmem:[#allocation3 + $0x8] sm:$0xff] %vm247_vm5, %v446_v6  ;;  %2404 = vmatmul.mubr.msk.f32.vlgmr.msra.gmra.mxu0 %vm247_vm5, %v446_v6 }
 0x5aa   :  { %2418 = vmatpush3.msra.mxu0 %v2872_v4  ;;  %2425 = vmatprep.mubr.msk.f32.mxu0 %vm2782_vm0, %v2781_v0 }
 0x5ab   :  { %2419 = vmatprep.subr.mxu0 %v2781_v0 }
 0x5ac   :  { %2420 = vmatpush3.msra.mxu0 %v2884_v7 }
 0x5ad   :  { %2421 = vmatprep.subr.mxu0 %v2781_v0 }
 0x5ae   :  { %2422 = vmatpush3.msra.mxu0 %v2902_v10 }
 0x5af   :  { %2423 = vmatprep.subr.mxu0 %v2781_v0 }
 0x5b0   :  { %2424 = vmatpush3.msra.mxu0 %v2912_v11 }
 0x5b1   :  { %2439 = vmatprep.subr.mxu0 %v2781_v0 }
 0x669   :  { %v520_v8 = vpop.f32.mrf.mxu0 }
 0x66a   :  { %v524_v9 = vadd.f32 %v520_v8, %v2952_v24 }
 0x66b   :  { %v2405_v12 = vpop.f32.mrf.mxu0 }
 0x66c   :  { %v525_v13 = vmul.f32 %v524_v9, %v2962_v35 }
 0x66e   :  { %2634 = vtanh.f32 %v525_v13 }
 0x67b   :  { %v2635_v14 = vpop.eup %2634 }
 0x67c   :  { %v527_v15 = vmul.f32 %v2635_v14, %v2962_v35 }
 0x67e   :  { %v528_v16 = vadd.f32 %v527_v15, %v2965_v41 }
 0x680   :  { %531 = vrot.lane.b32.xlu0 %v528_v16, %s2784_s5  ;;  %v529_v19 = vmul.f32 %v528_v16, %v437_v1 }
 0x6f2   :  { %v532_v17 = vpop.permute.xlu0 %531 }
 0x6f3   :  { %v534_v18 = vmul.f32 %v532_v17, %v528_v16  ;;  %v1071_v17 = vld [vmem:[#allocation3] sm:$0xff] }
 0x6f5   :  { %536 = vrot.lane.b32.xlu1 %v534_v18, %s2785_s17  ;;  %v1063_v18 = vld [vmem:[%s3328_s2 + $0x8] sm:$0xff] }
 0x767   :  { %v537_v20 = vpop.permute.xlu1 %536 }
 0x768   :  { %v539_v22 = vadd.f32 %v537_v20, %v529_v19  ;;  %v1062_v19 = vld [vmem:[%s3328_s2] sm:$0xff]  ;;  %v1072_v20 = vld [vmem:[#allocation3 + $0x8] sm:$0xff] }
 0x76a   :  { %2636 = vtanh.f32 %v539_v22 }
 0x777   :  { %v2637_v23 = vpop.eup %2636 }
 0x778   :  { %542 = vrot.lane.b32.xlu0 %v2637_v23, %s2784_s5 }
 0x7ea   :  { %v543_v24 = vpop.permute.xlu0 %542 }
 0x7eb   :  { %v545_v25 = vmul.f32 %v543_v24, %v528_v16  ;;  %v1064_v16 = vld [vmem:[%s3328_s2 + $0x10] sm:$0xff] }
 0x7ed   :  { %547 = vrot.lane.b32.xlu1 %v545_v25, %s2785_s17 }
 0x85f   :  { %v548_v27 = vpop.permute.xlu1 %547 }
 0x860   :  { %551 = vst.msk [vmem:[#allocation3 + $0x10] sm:$0xff] %vm247_vm5, %v548_v27  ;;  %2415 = vmatmul.mubr.msk.f32.vlgmr.msra.gmra.mxu1 %vm247_vm5, %v548_v27 }
 0x861   :  { %2429 = vmatpush3.msra.mxu1 %v2872_v4  ;;  %2436 = vmatprep.mubr.msk.f32.mxu1 %vm2782_vm0, %v2781_v0 }
 0x862   :  { %2430 = vmatprep.subr.mxu1 %v2781_v0 }
 0x863   :  { %2431 = vmatpush3.msra.mxu1 %v2884_v7 }
 0x864   :  { %2432 = vmatprep.subr.mxu1 %v2781_v0 }
 0x865   :  { %2433 = vmatpush3.msra.mxu1 %v2902_v10 }
 0x866   :  { %2434 = vmatprep.subr.mxu1 %v2781_v0 }
 0x867   :  { %2435 = vmatpush3.msra.mxu1 %v2912_v11 }
 0x868   :  { %2450 = vmatprep.subr.mxu1 %v2781_v0 }
 0x920   :  { %v622_v29 = vpop.f32.mrf.mxu1 }
 0x921   :  { %v626_v31 = vadd.f32 %v622_v29, %v2950_v21 }
 0x922   :  { %v2416_v32 = vpop.f32.mrf.mxu1 }
 0x923   :  { %v627_v34 = vmul.f32 %v626_v31, %v2962_v35 }
 0x925   :  { %2638 = vtanh.f32 %v627_v34 }
 0x932   :  { %v2639_v36 = vpop.eup %2638 }
 0x933   :  { %v629_v37 = vmul.f32 %v2639_v36, %v2962_v35 }
 0x935   :  { %v630_v38 = vadd.f32 %v629_v37, %v2965_v41 }
 0x937   :  { %633 = vrot.lane.b32.xlu0 %v630_v38, %s2784_s5  ;;  %v631_v42 = vmul.f32 %v630_v38, %v539_v22  ;;  %v1073_v22 = vld [vmem:[#allocation3 + $0x10] sm:$0xff] }
 0x9a9   :  { %v634_v39 = vpop.permute.xlu0 %633 }
 0x9aa   :  { %v636_v40 = vmul.f32 %v634_v39, %v630_v38 }
 0x9ac   :  { %638 = vrot.lane.b32.xlu1 %v636_v40, %s2785_s17 }
 0xa1e   :  { %v639_v43 = vpop.permute.xlu1 %638 }
 0xa1f   :  { %v641_v44 = vadd.f32 %v639_v43, %v631_v42 }
 0xa21   :  { %2640 = vtanh.f32 %v641_v44 }
 0xa2e   :  { %v2641_v21 = vpop.eup %2640 }
 0xa2f   :  { %644 = vrot.lane.b32.xlu0 %v2641_v21, %s2784_s5  ;;  %v3105_v21 = vld [vmem:[#allocation4 + $0x10] sm:$0xff] }
 0xaa1   :  { %v645_v45 = vpop.permute.xlu0 %644 }
 0xaa2   :  { %v647_v46 = vmul.f32 %v645_v45, %v630_v38  ;;  %v3109_v45 = vld [vmem:[#allocation4 + $0x8] sm:$0xff] }
 0xaa4   :  { %649 = vrot.lane.b32.xlu1 %v647_v46, %s2785_s17  ;;  %v3113_v46 = vld [vmem:[#allocation4] sm:$0xff] }
 0xb16   :  { %v650_v47 = vpop.permute.xlu1 %649 }
 0xb17   :  { %653 = vst.msk [vmem:[#allocation3 + $0x18] sm:$0xff] %vm247_vm5, %v650_v47  ;;  %2426 = vmatmul.mubr.msk.f32.vlgmr.msra.gmra.mxu0 %vm247_vm5, %v650_v47 }
 0xb18   :  { %2440 = vmatpush3.msra.mxu0 %v2872_v4  ;;  %2447 = vmatprep.mubr.msk.f32.mxu0 %vm2782_vm0, %v2781_v0 }
 0xb19   :  { %2441 = vmatprep.subr.mxu0 %v2781_v0 }
 0xb1a   :  { %2442 = vmatpush3.msra.mxu0 %v2884_v7 }
 0xb1b   :  { %2443 = vmatprep.subr.mxu0 %v2781_v0 }
 0xb1c   :  { %2444 = vmatpush3.msra.mxu0 %v2902_v10 }
 0xb1d   :  { %2445 = vmatprep.subr.mxu0 %v2781_v0 }
 0xb1e   :  { %2446 = vmatpush3.msra.mxu0 %v2912_v11  ;;  %v1074_v23 = vld [vmem:[#allocation3 + $0x18] sm:$0xff] }
 0xbd7   :  { %v724_v48 = vpop.f32.mrf.mxu0 }
 0xbd8   :  { %v728_v49 = vadd.f32 %v724_v48, %v2956_v28 }
 0xbd9   :  { %v2427_v50 = vpop.f32.mrf.mxu0 }
 0xbda   :  { %v729_v51 = vmul.f32 %v728_v49, %v2962_v35 }
 0xbdc   :  { %2642 = vtanh.f32 %v729_v51 }
 0xbe9   :  { %v2643_v52 = vpop.eup %2642 }
 0xbea   :  { %v731_v53 = vmul.f32 %v2643_v52, %v2962_v35 }
 0xbec   :  { %v732_v54 = vadd.f32 %v731_v53, %v2965_v41 }
 0xbee   :  { %735 = vrot.lane.b32.xlu0 %v732_v54, %s2784_s5  ;;  %v733_v57 = vmul.f32 %v732_v54, %v641_v44  ;;  %v3102_v44 = vld [vmem:[#allocation4 + $0x18] sm:$0xff] }
 0xc60   :  { %v736_v55 = vpop.permute.xlu0 %735 }
 0xc61   :  { %v738_v56 = vmul.f32 %v736_v55, %v732_v54 }
 0xc63   :  { %740 = vrot.lane.b32.xlu1 %v738_v56, %s2785_s17  ;;  %v3147_v56 = vld [vmem:[%s3332_s6] ss:$0 sm:$0xff] }
 0xcd5   :  { %v741_v58 = vpop.permute.xlu1 %740 }
 0xcd6   :  { %v743_v59 = vadd.f32 %v741_v58, %v733_v57 }
 0xcd8   :  { %2644 = vtanh.f32 %v743_v59 }
 0xce5   :  { %v2645_v28 = vpop.eup %2644 }
 0xce6   :  { %746 = vrot.lane.b32.xlu0 %v2645_v28, %s2784_s5 }
 0xd58   :  { %v747_v60 = vpop.permute.xlu0 %746 }
 0xd59   :  { %v749_v61 = vmul.f32 %v747_v60, %v732_v54 }
 0xd5b   :  { %751 = vrot.lane.b32.xlu1 %v749_v61, %s2785_s17 }
 0xdcd   :  { %v752_v62 = vpop.permute.xlu1 %751 }
 0xdce   :  { %755 = vst.msk [vmem:[#allocation3 + $0x20] sm:$0xff] %vm247_vm5, %v752_v62  ;;  %2437 = vmatmul.mubr.msk.f32.vlgmr.msra.gmra.mxu1 %vm247_vm5, %v752_v62 }
 0xdcf   :  { %2451 = vmatpush3.msra.mxu1 %v2872_v4  ;;  %2458 = vmatprep.mubr.msk.f32.mxu1 %vm2782_vm0, %v2781_v0 }
 0xdd0   :  { %2452 = vmatprep.subr.mxu1 %v2781_v0 }
 0xdd1   :  { %2453 = vmatpush3.msra.mxu1 %v2884_v7 }
 0xdd2   :  { %2454 = vmatprep.subr.mxu1 %v2781_v0 }
 0xdd3   :  { %2455 = vmatpush3.msra.mxu1 %v2902_v10 }
 0xdd4   :  { %2456 = vmatprep.subr.mxu1 %v2781_v0 }
 0xdd5   :  { %2457 = vmatpush3.msra.mxu1 %v2912_v11  ;;  %v1075_v24 = vld [vmem:[#allocation3 + $0x20] sm:$0xff] }
 0xdd6   :  { %2481 = vmatprep.subr.mxu1 %v2781_v0 }
 0xe8e   :  { %v826_v63 = vpop.f32.mrf.mxu1 }
 0xe8f   :  { %v830_v4 = vadd.f32 %v826_v63, %v2954_v26  ;;  %v1065_v26 = vld [vmem:[%s3328_s2 + $0x18] sm:$0xff] }
 0xe90   :  { %v2438_v1 = vpop.f32.mrf.mxu1  ;;  %2461 = vmatprep.subr.mxu0 %v1065_v26 }
 0xe91   :  { %v831_v2 = vmul.f32 %v830_v4, %v2962_v35 }
 0xe93   :  { %2646 = vtanh.f32 %v831_v2 }
 0xea0   :  { %v2647_v3 = vpop.eup %2646 }
 0xea1   :  { %v833_v7 = vmul.f32 %v2647_v3, %v2962_v35 }
 0xea3   :  { %v834_v5 = vadd.f32 %v833_v7, %v2965_v41 }
 0xea5   :  { %837 = vrot.lane.b32.xlu0 %v834_v5, %s2784_s5  ;;  %v835_v11 = vmul.f32 %v834_v5, %v743_v59 }
 0xf17   :  { %v838_v10 = vpop.permute.xlu0 %837 }
 0xf18   :  { %v840_v6 = vmul.f32 %v838_v10, %v834_v5 }
 0xf1a   :  { %842 = vrot.lane.b32.xlu1 %v840_v6, %s2785_s17 }
 0xf8c   :  { %v843_v8 = vpop.permute.xlu1 %842 }
 0xf8d   :  { %v845_v9 = vadd.f32 %v843_v8, %v835_v11 }
 0xf8f   :  { %2648 = vtanh.f32 %v845_v9 }
 0xf9c   :  { %v2649_v12 = vpop.eup %2648 }
 0xf9d   :  { %848 = vrot.lane.b32.xlu0 %v2649_v12, %s2784_s5 }
0x100f   :  { %v849_v13 = vpop.permute.xlu0 %848 }
0x1010   :  { %v851_v14 = vmul.f32 %v849_v13, %v834_v5 }
0x1012   :  { %853 = vrot.lane.b32.xlu1 %v851_v14, %s2785_s17 }
0x1084   :  { %v854_v15 = vpop.permute.xlu1 %853 }
0x1085   :  { %857 = vst.msk [vmem:[#allocation3 + $0x28] sm:$0xff] %vm247_vm5, %v854_v15  ;;  %2448 = vmatmul.mubr.msk.f32.vlgmr.msra.gmra.mxu0 %vm247_vm5, %v854_v15 }
0x1086   :  { %2462 = vmatpush3.msra.mxu0 %v1065_v26  ;;  %2469 = vmatprep.mubr.msk.f32.mxu0 %vm247_vm5, %v1071_v17 }
0x1087   :  { %2463 = vmatprep.subr.mxu0 %v1064_v16 }
0x1088   :  { %2464 = vmatpush3.msra.mxu0 %v1064_v16 }
0x1089   :  { %2465 = vmatprep.subr.mxu0 %v1063_v18 }
0x108a   :  { %2466 = vmatpush3.msra.mxu0 %v1063_v18 }
0x108b   :  { %2467 = vmatprep.subr.mxu0 %v1062_v19 }
0x108c   :  { %2468 = vmatpush3.msra.mxu0 %v1062_v19  ;;  %v1076_v25 = vld [vmem:[#allocation3 + $0x28] sm:$0xff] }
0x108d   :  { %2470 = vmatmul.mubr.msk.f32.vlgmr.msra.gmra.mxu0 %vm247_vm5, %v1072_v20  ;;  %2503 = vmatprep.subr.mxu0 %v2781_v0 }
0x108e   :  { %2472 = vmatprep.mubr.msk.f32.mxu0 %vm247_vm5, %v1073_v22  ;;  %2504 = vmatpush3.msra.mxu0 %v3102_v44 }
0x108f   :  { %2505 = vmatprep.subr.mxu0 %v2781_v0 }
0x1090   :  { %2506 = vmatpush3.msra.mxu0 %v3105_v21 }
0x1091   :  { %2473 = vmatmul.mubr.msk.f32.gmra.mxu0 %vm247_vm5, %v1074_v23  ;;  %2507 = vmatprep.subr.mxu0 %v2781_v0 }
0x1092   :  { %2475 = vmatprep.mubr.msk.f32.mxu0 %vm247_vm5, %v1075_v24  ;;  %2508 = vmatpush3.msra.mxu0 %v3109_v45 }
0x1093   :  { %2509 = vmatprep.subr.mxu0 %v2781_v0 }
0x1094   :  { %2510 = vmatpush3.msra.mxu0 %v3113_v46 }
0x1095   :  { %2476 = vmatmul.mubr.msk.f32.gmra.mxu0 %vm247_vm5, %v1076_v25  ;;  %2525 = vmatprep.subr.mxu0 %v2781_v0 }
0x1145   :  { %v928_v27 = vpop.f32.mrf.mxu0 }
0x1146   :  { %v932_v29 = vadd.f32 %v928_v27, %v2960_v33 }
0x1147   :  { %v2449_v31 = vpop.f32.mrf.mxu0 }
0x1148   :  { %v933_v32 = vmul.f32 %v932_v29, %v2962_v35 }
0x114a   :  { %2650 = vtanh.f32 %v933_v32 }
0x114d   :  { %v2471_v51 = vpop.f32.mrf.mxu0 }
0x114e   :  { %v1181_v20 = vadd.f32 %v2471_v51, %v3147_v56 }
0x114f   :  { %v1175_v55 = vpop.f32.mrf.mxu0 }
0x1150   :  { %v1176_v57 = vadd.f32 %v3147_v56, %v1175_v55 }
0x1157   :  { %v2651_v34 = vpop.eup %2650 }
0x1158   :  { %v935_v36 = vmul.f32 %v2651_v34, %v2962_v35 }
0x115a   :  { %v936_v37 = vadd.f32 %v935_v36, %v2965_v41 }
0x115c   :  { %939 = vrot.lane.b32.xlu0 %v936_v37, %s2784_s5  ;;  %v937_v40 = vmul.f32 %v936_v37, %v845_v9 }
0x11ce   :  { %v940_v38 = vpop.permute.xlu0 %939 }
0x11cf   :  { %v942_v39 = vmul.f32 %v940_v38, %v936_v37 }
0x11d1   :  { %944 = vrot.lane.b32.xlu1 %v942_v39, %s2785_s17 }
0x1243   :  { %v945_v42 = vpop.permute.xlu1 %944 }
0x1244   :  { %v3098_v43 = vadd.f32 %v945_v42, %v937_v40 }
0x1246   :  { %2652 = vtanh.f32 %v3098_v43 }
0x1253   :  { %v2653_v33 = vpop.eup %2652 }
0x1254   :  { %950 = vrot.lane.b32.xlu0 %v2653_v33, %s2784_s5 }
0x12c6   :  { %v951_v47 = vpop.permute.xlu0 %950 }
0x12c7   :  { %v953_v48 = vmul.f32 %v951_v47, %v936_v37 }
0x12c9   :  { %955 = vrot.lane.b32.xlu1 %v953_v48, %s2785_s17  ;;  %v2474_v48 = vpop.f32.mrf.mxu0 }
0x133b   :  { %v956_v49 = vpop.permute.xlu1 %955 }
0x133c   :  { %959 = vst.msk [vmem:[#allocation3 + $0x30] sm:$0xff] %vm247_vm5, %v956_v49  ;;  %2459 = vmatmul.mubr.msk.f32.vlgmr.msra.gmra.mxu1 %vm247_vm5, %v956_v49  ;;  %v1185_v49 = vpop.f32.mrf.mxu0 }
0x133d   :  { %2482 = vmatpush3.msra.mxu1 %v3102_v44  ;;  %2489 = vmatprep.mubr.msk.f32.mxu1 %vm2782_vm0, %v2781_v0 }
0x133e   :  { %2483 = vmatprep.subr.mxu1 %v2781_v0 }
0x133f   :  { %2484 = vmatpush3.msra.mxu1 %v3105_v21 }
0x1340   :  { %2485 = vmatprep.subr.mxu1 %v2781_v0 }
0x1341   :  { %2486 = vmatpush3.msra.mxu1 %v3109_v45 }
0x1342   :  { %2487 = vmatprep.subr.mxu1 %v2781_v0 }
0x1343   :  { %2488 = vmatpush3.msra.mxu1 %v3113_v46  ;;  %v1077_v50 = vld [vmem:[#allocation3 + $0x30] sm:$0xff] }
0x1344   :  { %2490 = vmatmul.mubr.f32.vlgmr.msra.gmra.mxu1 %v2781_v0  ;;  %2478 = vmatprep.mubr.msk.f32.mxu0 %vm247_vm5, %v1077_v50  ;;  %v3199_v50 = vpop.f32.mrf.mxu0 }
0x1345   :  { %2492 = vmatprep.subr.mxu1 %v2781_v0  ;;  %2500 = vmatprep.mubr.msk.f32.mxu1 %vm2782_vm0, %v2781_v0 }
0x1346   :  { %2493 = vmatpush3.msra.mxu1 %v3102_v44  ;;  %v3201_v51 = vpop.f32.mrf.mxu0 }
0x1347   :  { %2494 = vmatprep.subr.mxu1 %v2781_v0 }
0x1348   :  { %2495 = vmatpush3.msra.mxu1 %v3105_v21 }
0x1349   :  { %2496 = vmatprep.subr.mxu1 %v2781_v0 }
0x134a   :  { %2497 = vmatpush3.msra.mxu1 %v3109_v45 }
0x134b   :  { %2498 = vmatprep.subr.mxu1 %v2781_v0 }
0x134c   :  { %2499 = vmatpush3.msra.mxu1 %v3113_v46 }
0x134d   :  { %2514 = vmatprep.subr.mxu1 %v2781_v0 }
0x13fc   :  { %v1030_v52 = vpop.f32.mrf.mxu1 }
0x13fd   :  { %v1034_v53 = vadd.f32 %v1030_v52, %v2958_v30 }
0x13fe   :  { %v2460_v54 = vpop.f32.mrf.mxu1 }
0x13ff   :  { %v1035_v1 = vmul.f32 %v1034_v53, %v2962_v35  ;;  %v1186_v54 = vadd.f32 %v3147_v56, %v1185_v49 }
0x1404   :  { %v1289_v58 = vpop.f32.mrf.mxu1 }
0x1405   :  { %v1293_v59 = vadd.f32 %v1289_v58, %v1176_v57 }
0x1406   :  { %v2491_v28 = vpop.f32.mrf.mxu1 }
0x1407   :  { %v1294_v60 = vmul.f32 %v1293_v59, %v2962_v35 }
0x1409   :  { %2654 = vtanh.f32 %v1294_v60 }
0x140a   :  { %2656 = vtanh.f32 %v1035_v1 }
0x1416   :  { %v2655_v61 = vpop.eup %2654 }
0x1417   :  { %v1296_v62 = vmul.f32 %v2655_v61, %v2962_v35  ;;  %v2657_v5 = vpop.eup %2656 }
0x1418   :  { %v1037_v10 = vmul.f32 %v2657_v5, %v2962_v35 }
0x1419   :  { %v1297_v30 = vadd.f32 %v1296_v62, %v2965_v41 }
0x141a   :  { %v1038_v11 = vadd.f32 %v1037_v10, %v2965_v41  ;;  %v1191_v10 = vadd.f32 %v2474_v48, %v3147_v56 }
0x141b   :  { %1300 = vrot.lane.b32.xlu0 %v1297_v30, %s2784_s5  ;;  %v1298_v2 = vmul.f32 0.0, %v1297_v30 }
0x141c   :  { %v1039_v14 = vmul.f32 %v1038_v11, %v3098_v43 }
0x148d   :  { %v1301_v63 = vpop.permute.xlu0 %1300 }
0x148e   :  { %v1303_v4 = vmul.f32 %v1301_v63, %v1297_v30 }
0x1490   :  { %1305 = vrot.lane.b32.xlu1 %v1303_v4, %s2785_s17 }
0x1502   :  { %v1306_v3 = vpop.permute.xlu1 %1305 }
0x1503   :  { %v1308_v7 = vadd.f32 %v1306_v3, %v1298_v2 }
0x1505   :  { %2658 = vtanh.f32 %v1308_v7 }
0x1512   :  { %v2659_v6 = vpop.eup %2658 }
0x1513   :  { %1311 = vrot.lane.b32.xlu0 %v2659_v6, %s2784_s5 }
0x1517   :  { %1041 = vrot.lane.b32.xlu0 %v1038_v11, %s2784_s5 }
0x1585   :  { %v1312_v8 = vpop.permute.xlu0 %1311 }
0x1586   :  { %v1314_v9 = vmul.f32 %v1312_v8, %v1297_v30 }
0x1588   :  { %1317 = vrot.lane.b32.xlu1 %v1314_v9, %s2785_s17 }
0x1589   :  { %v1042_v26 = vpop.permute.xlu0 %1041 }
0x158a   :  { %v1044_v12 = vmul.f32 %v1042_v26, %v1038_v11 }
0x158c   :  { %1046 = vrot.lane.b32.xlu0 %v1044_v12, %s2785_s17 }
0x15fa   :  { %v1318_v13 = vpop.permute.xlu1 %1317 }
0x15fb   :  { %2501 = vmatmul.mubr.msk.f32.vlgmr.msra.gmra.mxu1 %vm247_vm5, %v1318_v13 }
0x15fc   :  { %2515 = vmatpush3.msra.mxu1 %v3102_v44  ;;  %2522 = vmatprep.mubr.msk.f32.mxu1 %vm2782_vm0, %v2781_v0 }
0x15fd   :  { %2516 = vmatprep.subr.mxu1 %v2781_v0 }
0x15fe   :  { %v1047_v15 = vpop.permute.xlu0 %1046  ;;  %2517 = vmatpush3.msra.mxu1 %v3105_v21 }
0x15ff   :  { %v1049_v16 = vadd.f32 %v1047_v15, %v1039_v14  ;;  %2518 = vmatprep.subr.mxu1 %v2781_v0 }
0x1600   :  { %2519 = vmatpush3.msra.mxu1 %v3109_v45 }
0x1601   :  { %2660 = vtanh.f32 %v1049_v16  ;;  %2520 = vmatprep.subr.mxu1 %v2781_v0 }
0x1602   :  { %2521 = vmatpush3.msra.mxu1 %v3113_v46 }
0x1603   :  { %2536 = vmatprep.subr.mxu1 %v2781_v0 }
0x160e   :  { %v2661_v17 = vpop.eup %2660 }
0x160f   :  { %1052 = vrot.lane.b32.xlu0 %v2661_v17, %s2784_s5 }
0x1681   :  { %v1053_v18 = vpop.permute.xlu0 %1052 }
0x1682   :  { %v1055_v19 = vmul.f32 %v1053_v18, %v1038_v11 }
0x1684   :  { %1057 = vrot.lane.b32.xlu0 %v1055_v19, %s2785_s17 }
0x16bb   :  { %v1387_v22 = vpop.f32.mrf.mxu1 }
0x16bc   :  { %v1391_v23 = vadd.f32 %v1387_v22, %v1181_v20 }
0x16bd   :  { %v2502_v24 = vpop.f32.mrf.mxu1 }
0x16be   :  { %v1392_v25 = vmul.f32 %v1391_v23, %v2962_v35  ;;  %v1196_v24 = vadd.f32 %v3147_v56, %v3201_v51 }
0x16c0   :  { %2662 = vtanh.f32 %v1392_v25 }
0x16cd   :  { %v2663_v27 = vpop.eup %2662 }
0x16ce   :  { %v1394_v29 = vmul.f32 %v2663_v27, %v2962_v35 }
0x16d0   :  { %v1395_v31 = vadd.f32 %v1394_v29, %v2965_v41 }
0x16d2   :  { %1398 = vrot.lane.b32.xlu1 %v1395_v31, %s2784_s5  ;;  %v1396_v38 = vmul.f32 %v1395_v31, %v1308_v7 }
0x16f6   :  { %v1058_v32 = vpop.permute.xlu0 %1057 }
0x16f7   :  { %1061 = vst.msk [vmem:[#allocation3 + $0x38] sm:$0xff] %vm247_vm5, %v1058_v32 }
0x16fe   :  { %v1078_v34 = vld [vmem:[#allocation3 + $0x38] sm:$0xff] }
0x16ff   :  { %2479 = vmatmul.mubr.msk.f32.gmra.mxu0 %vm247_vm5, %v1078_v34 }
0x1700   :  { %2511 = vmatprep.mubr.msk.f32.mxu0 %vm2782_vm0, %v2781_v0 }
0x1744   :  { %v1399_v36 = vpop.permute.xlu1 %1398 }
0x1745   :  { %v1401_v37 = vmul.f32 %v1399_v36, %v1395_v31 }
0x1747   :  { %1403 = vrot.lane.b32.xlu1 %v1401_v37, %s2785_s17 }
0x17b9   :  { %v1404_v39 = vpop.permute.xlu1 %1403 }
0x17ba   :  { %v1406_v40 = vadd.f32 %v1404_v39, %v1396_v38 }
0x17bc   :  { %2664 = vtanh.f32 %v1406_v40 }
0x17bf   :  { %v3203_v52 = vpop.f32.mrf.mxu0 }
0x17c1   :  { %v3205_v53 = vpop.f32.mrf.mxu0 }
0x17c9   :  { %v2665_v42 = vpop.eup %2664 }
0x17ca   :  { %1409 = vrot.lane.b32.xlu1 %v2665_v42, %s2784_s5 }
0x183c   :  { %v1410_v43 = vpop.permute.xlu1 %1409 }
0x183d   :  { %v1412_v33 = vmul.f32 %v1410_v43, %v1395_v31 }
0x183f   :  { %1415 = vrot.lane.b32.xlu1 %v1412_v33, %s2785_s17 }
0x18b1   :  { %v1416_v47 = vpop.permute.xlu1 %1415 }
0x18b2   :  { %2512 = vmatmul.mubr.msk.f32.vlgmr.msra.gmra.mxu0 %vm247_vm5, %v1416_v47 }
0x18b3   :  { %2526 = vmatpush3.msra.mxu0 %v3102_v44  ;;  %2533 = vmatprep.mubr.msk.f32.mxu0 %vm2782_vm0, %v2781_v0 }
0x18b4   :  { %2527 = vmatprep.subr.mxu0 %v2781_v0 }
0x18b5   :  { %2528 = vmatpush3.msra.mxu0 %v3105_v21 }
0x18b6   :  { %2529 = vmatprep.subr.mxu0 %v2781_v0 }
0x18b7   :  { %2530 = vmatpush3.msra.mxu0 %v3109_v45 }
0x18b8   :  { %2531 = vmatprep.subr.mxu0 %v2781_v0 }
0x18b9   :  { %2532 = vmatpush3.msra.mxu0 %v3113_v46 }
0x18ba   :  { %2547 = vmatprep.subr.mxu0 %v2781_v0 }
0x1972   :  { %v1485_v55 = vpop.f32.mrf.mxu0 }
0x1973   :  { %v1489_v57 = vadd.f32 %v1485_v55, %v1186_v54 }
0x1974   :  { %v2513_v58 = vpop.f32.mrf.mxu0 }
0x1975   :  { %v1490_v59 = vmul.f32 %v1489_v57, %v2962_v35 }
0x1977   :  { %2666 = vtanh.f32 %v1490_v59 }
0x1984   :  { %v2667_v28 = vpop.eup %2666 }
0x1985   :  { %v1492_v60 = vmul.f32 %v2667_v28, %v2962_v35 }
0x1987   :  { %v1493_v61 = vadd.f32 %v1492_v60, %v2965_v41 }
0x1989   :  { %1496 = vrot.lane.b32.xlu0 %v1493_v61, %s2784_s5  ;;  %v1494_v63 = vmul.f32 %v1493_v61, %v1406_v40 }
0x19fb   :  { %v1497_v62 = vpop.permute.xlu0 %1496 }
0x19fc   :  { %v1499_v30 = vmul.f32 %v1497_v62, %v1493_v61 }
0x19fe   :  { %1501 = vrot.lane.b32.xlu1 %v1499_v30, %s2785_s17 }
0x1a70   :  { %v1502_v4 = vpop.permute.xlu1 %1501 }
0x1a71   :  { %v1504_v1 = vadd.f32 %v1502_v4, %v1494_v63  ;;  %v1206_v63 = vadd.f32 %v3147_v56, %v3205_v53 }
0x1a73   :  { %2668 = vtanh.f32 %v1504_v1 }
0x1a80   :  { %v2669_v2 = vpop.eup %2668 }
0x1a81   :  { %1507 = vrot.lane.b32.xlu0 %v2669_v2, %s2784_s5 }
0x1af3   :  { %v1508_v3 = vpop.permute.xlu0 %1507 }
0x1af4   :  { %v1510_v7 = vmul.f32 %v1508_v3, %v1493_v61 }
0x1af6   :  { %1513 = vrot.lane.b32.xlu1 %v1510_v7, %s2785_s17 }
0x1b68   :  { %v1514_v5 = vpop.permute.xlu1 %1513 }
0x1b69   :  { %2523 = vmatmul.mubr.msk.f32.vlgmr.msra.gmra.mxu1 %vm247_vm5, %v1514_v5 }
0x1b6a   :  { %2537 = vmatpush3.msra.mxu1 %v3102_v44  ;;  %2544 = vmatprep.mubr.msk.f32.mxu1 %vm2782_vm0, %v2781_v0 }
0x1b6b   :  { %2538 = vmatprep.subr.mxu1 %v2781_v0 }
0x1b6c   :  { %2539 = vmatpush3.msra.mxu1 %v3105_v21 }
0x1b6d   :  { %2540 = vmatprep.subr.mxu1 %v2781_v0 }
0x1b6e   :  { %2541 = vmatpush3.msra.mxu1 %v3109_v45 }
0x1b6f   :  { %2542 = vmatprep.subr.mxu1 %v2781_v0 }
0x1b70   :  { %2543 = vmatpush3.msra.mxu1 %v3113_v46 }
0x1b71   :  { %2558 = vmatprep.subr.mxu1 %v2781_v0 }
0x1c29   :  { %v1583_v6 = vpop.f32.mrf.mxu1 }
0x1c2a   :  { %v1587_v11 = vadd.f32 %v1583_v6, %v1191_v10 }
0x1c2b   :  { %v2524_v8 = vpop.f32.mrf.mxu1 }
0x1c2c   :  { %v1588_v9 = vmul.f32 %v1587_v11, %v2962_v35 }
0x1c2e   :  { %2670 = vtanh.f32 %v1588_v9 }
0x1c3b   :  { %v2671_v26 = vpop.eup %2670 }
0x1c3c   :  { %v1590_v12 = vmul.f32 %v2671_v26, %v2962_v35 }
0x1c3e   :  { %v1591_v13 = vadd.f32 %v1590_v12, %v2965_v41 }
0x1c40   :  { %1594 = vrot.lane.b32.xlu0 %v1591_v13, %s2784_s5  ;;  %v1592_v16 = vmul.f32 %v1591_v13, %v1504_v1 }
0x1cb2   :  { %v1595_v14 = vpop.permute.xlu0 %1594 }
0x1cb3   :  { %v1597_v15 = vmul.f32 %v1595_v14, %v1591_v13 }
0x1cb5   :  { %1599 = vrot.lane.b32.xlu1 %v1597_v15, %s2785_s17  ;;  %v1211_v15 = vadd.f32 %v3203_v52, %v3147_v56  ;;  %v2004_v52 = vld [vmem:[#allocation7 + $0x18] sm:$0xff] }
0x1d27   :  { %v1600_v17 = vpop.permute.xlu1 %1599 }
0x1d28   :  { %v1602_v18 = vadd.f32 %v1600_v17, %v1592_v16 }
0x1d2a   :  { %2672 = vtanh.f32 %v1602_v18 }
0x1d37   :  { %v2673_v19 = vpop.eup %2672 }
0x1d38   :  { %1605 = vrot.lane.b32.xlu0 %v2673_v19, %s2784_s5 }
0x1daa   :  { %v1606_v20 = vpop.permute.xlu0 %1605 }
0x1dab   :  { %v1608_v22 = vmul.f32 %v1606_v20, %v1591_v13 }
0x1dad   :  { %1611 = vrot.lane.b32.xlu1 %v1608_v22, %s2785_s17 }
0x1e1f   :  { %v1612_v23 = vpop.permute.xlu1 %1611 }
0x1e20   :  { %2534 = vmatmul.mubr.msk.f32.vlgmr.msra.gmra.mxu0 %vm247_vm5, %v1612_v23 }
0x1e21   :  { %2548 = vmatpush3.msra.mxu0 %v3102_v44  ;;  %2555 = vmatprep.mubr.msk.f32.mxu0 %vm2782_vm0, %v2781_v0 }
0x1e22   :  { %2549 = vmatprep.subr.mxu0 %v2781_v0 }
0x1e23   :  { %2550 = vmatpush3.msra.mxu0 %v3105_v21 }
0x1e24   :  { %2551 = vmatprep.subr.mxu0 %v2781_v0 }
0x1e25   :  { %2552 = vmatpush3.msra.mxu0 %v3109_v45 }
0x1e26   :  { %2553 = vmatprep.subr.mxu0 %v2781_v0 }
0x1e27   :  { %2554 = vmatpush3.msra.mxu0 %v3113_v46 }
0x1e28   :  { %2569 = vmatprep.subr.mxu0 %v2781_v0 }
0x1ee0   :  { %v1681_v25 = vpop.f32.mrf.mxu0 }
0x1ee1   :  { %v1685_v27 = vadd.f32 %v1681_v25, %v1196_v24 }
0x1ee2   :  { %v2535_v29 = vpop.f32.mrf.mxu0 }
0x1ee3   :  { %v1686_v31 = vmul.f32 %v1685_v27, %v2962_v35 }
0x1ee5   :  { %2674 = vtanh.f32 %v1686_v31  ;;  %v2003_v31 = vld [vmem:[#allocation7 + $0x10] sm:$0xff] }
0x1ef2   :  { %v2675_v32 = vpop.eup %2674 }
0x1ef3   :  { %v1688_v34 = vmul.f32 %v2675_v32, %v2962_v35  ;;  %v2002_v32 = vld [vmem:[#allocation7 + $0x8] sm:$0xff] }
0x1ef5   :  { %v1689_v36 = vadd.f32 %v1688_v34, %v2965_v41  ;;  %v2021_v34 = vld [vmem:[#allocation9 + $0x78] sm:$0xff] }
0x1ef7   :  { %1692 = vrot.lane.b32.xlu0 %v1689_v36, %s2784_s5  ;;  %v1690_v39 = vmul.f32 %v1689_v36, %v1602_v18 }
0x1f69   :  { %v1693_v37 = vpop.permute.xlu0 %1692 }
0x1f6a   :  { %v1695_v38 = vmul.f32 %v1693_v37, %v1689_v36  ;;  %v2019_v37 = vld [vmem:[#allocation9 + $0x68] sm:$0xff] }
0x1f6c   :  { %1697 = vrot.lane.b32.xlu1 %v1695_v38, %s2785_s17  ;;  %v2018_v38 = vld [vmem:[#allocation9 + $0x60] sm:$0xff] }
0x1fde   :  { %v1698_v40 = vpop.permute.xlu1 %1697 }
0x1fdf   :  { %v1700_v42 = vadd.f32 %v1698_v40, %v1690_v39  ;;  %v2017_v39 = vld [vmem:[#allocation9 + $0x58] sm:$0xff]  ;;  %v2016_v40 = vld [vmem:[#allocation9 + $0x50] sm:$0xff] }
0x1fe1   :  { %2676 = vtanh.f32 %v1700_v42 }
0x1fee   :  { %v2677_v43 = vpop.eup %2676 }
0x1fef   :  { %1703 = vrot.lane.b32.xlu0 %v2677_v43, %s2784_s5  ;;  %v2015_v43 = vld [vmem:[#allocation9 + $0x48] sm:$0xff] }
0x2061   :  { %v1704_v33 = vpop.permute.xlu0 %1703 }
0x2062   :  { %v1706_v47 = vmul.f32 %v1704_v33, %v1689_v36  ;;  %v2020_v36 = vld [vmem:[#allocation9 + $0x70] sm:$0xff] }
0x2064   :  { %1709 = vrot.lane.b32.xlu1 %v1706_v47, %s2785_s17  ;;  %v2014_v47 = vld [vmem:[#allocation9 + $0x40] sm:$0xff] }
0x20d6   :  { %v1710_v48 = vpop.permute.xlu1 %1709 }
0x20d7   :  { %2545 = vmatmul.mubr.msk.f32.vlgmr.msra.gmra.mxu1 %vm247_vm5, %v1710_v48  ;;  %v2013_v48 = vld [vmem:[#allocation9 + $0x38] sm:$0xff] }
0x20d8   :  { %2559 = vmatpush3.msra.mxu1 %v3102_v44  ;;  %2566 = vmatprep.mubr.msk.f32.mxu1 %vm2782_vm0, %v2781_v0  ;;  %v1201_v44 = vadd.f32 %v3199_v50, %v3147_v56 }
0x20d9   :  { %2560 = vmatprep.subr.mxu1 %v2781_v0 }
0x20da   :  { %2561 = vmatpush3.msra.mxu1 %v3105_v21 }
0x20db   :  { %2562 = vmatprep.subr.mxu1 %v2781_v0 }
0x20dc   :  { %2563 = vmatpush3.msra.mxu1 %v3109_v45 }
0x20dd   :  { %2564 = vmatprep.subr.mxu1 %v2781_v0 }
0x20de   :  { %2565 = vmatpush3.msra.mxu1 %v3113_v46 }
0x20df   :  { %2580 = vmatprep.subr.mxu1 %v2781_v0 }
0x2197   :  { %v1779_v49 = vpop.f32.mrf.mxu1 }
0x2198   :  { %v1783_v51 = vadd.f32 %v1779_v49, %v1201_v44  ;;  %v2012_v44 = vld [vmem:[#allocation9 + $0x30] sm:$0xff]  ;;  %v2011_v49 = vld [vmem:[#allocation9 + $0x28] sm:$0xff] }
0x2199   :  { %v2546_v54 = vpop.f32.mrf.mxu1 }
0x219a   :  { %v1784_v55 = vmul.f32 %v1783_v51, %v2962_v35  ;;  %v2010_v51 = vld [vmem:[#allocation9 + $0x20] sm:$0xff]  ;;  %v2009_v54 = vld [vmem:[#allocation9 + $0x18] sm:$0xff] }
0x219c   :  { %2678 = vtanh.f32 %v1784_v55 }
0x21a9   :  { %v2679_v21 = vpop.eup %2678 }
0x21aa   :  { %v1786_v57 = vmul.f32 %v2679_v21, %v2962_v35  ;;  %v2008_v21 = vld [vmem:[#allocation9 + $0x10] sm:$0xff] }
0x21ac   :  { %v1787_v45 = vadd.f32 %v1786_v57, %v2965_v41  ;;  %v2007_v57 = vld [vmem:[#allocation9 + $0x8] sm:$0xff] }
0x21ae   :  { %1790 = vrot.lane.b32.xlu0 %v1787_v45, %s2784_s5  ;;  %v1788_v59 = vmul.f32 %v1787_v45, %v1700_v42 }
0x2220   :  { %v1791_v58 = vpop.permute.xlu0 %1790 }
0x2221   :  { %v1793_v46 = vmul.f32 %v1791_v58, %v1787_v45  ;;  %v2230_v58 = vld [vmem:[%s3334_s8] ss:$0 sm:$0xff] }
0x2223   :  { %1795 = vrot.lane.b32.xlu1 %v1793_v46, %s2785_s17 }
0x2295   :  { %v1796_v28 = vpop.permute.xlu1 %1795 }
0x2296   :  { %v1798_v50 = vadd.f32 %v1796_v28, %v1788_v59 }
0x2298   :  { %2680 = vtanh.f32 %v1798_v50 }
0x22a5   :  { %v2681_v60 = vpop.eup %2680 }
0x22a6   :  { %1801 = vrot.lane.b32.xlu0 %v2681_v60, %s2784_s5  ;;  %v2232_v60 = vld [vmem:[%s3336_s10] ss:$0 sm:$0xff] }
0x2318   :  { %v1802_v61 = vpop.permute.xlu0 %1801 }
0x2319   :  { %v1804_v62 = vmul.f32 %v1802_v61, %v1787_v45  ;;  %v2006_v45 = vld [vmem:[#allocation9] sm:$0xff] }
0x231b   :  { %1807 = vrot.lane.b32.xlu1 %v1804_v62, %s2785_s17 }
0x238d   :  { %v1808_v30 = vpop.permute.xlu1 %1807 }
0x238e   :  { %2556 = vmatmul.mubr.msk.f32.vlgmr.msra.gmra.mxu0 %vm247_vm5, %v1808_v30 }
0x238f   :  { %2577 = vmatprep.mubr.msk.f32.mxu0 %vm2782_vm0, %v2781_v0  ;;  %2570 = vmatpush3.msra.mxu0 %v2004_v52 }
0x2390   :  { %2571 = vmatprep.subr.mxu0 %v2781_v0 }
0x2391   :  { %2572 = vmatpush3.msra.mxu0 %v2003_v31 }
0x2392   :  { %2573 = vmatprep.subr.mxu0 %v2781_v0 }
0x2393   :  { %2574 = vmatpush3.msra.mxu0 %v2002_v32 }
0x2394   :  { %2575 = vmatprep.subr.mxu0 %v2781_v0 }
0x244e   :  { %v1877_v4 = vpop.f32.mrf.mxu0 }
0x244f   :  { %v1881_v1 = vadd.f32 %v1877_v4, %v1206_v63 }
0x2450   :  { %v2557_v2 = vpop.f32.mrf.mxu0 }
0x2451   :  { %v1882_v3 = vmul.f32 %v1881_v1, %v2962_v35 }
0x2453   :  { %2682 = vtanh.f32 %v1882_v3 }
0x2460   :  { %v2683_v7 = vpop.eup %2682 }
0x2461   :  { %v1884_v5 = vmul.f32 %v2683_v7, %v2962_v35 }
0x2463   :  { %v1885_v10 = vadd.f32 %v1884_v5, %v2965_v41 }
0x2465   :  { %1888 = vrot.lane.b32.xlu0 %v1885_v10, %s2784_s5  ;;  %v1886_v8 = vmul.f32 %v1885_v10, %v1798_v50 }
0x24d7   :  { %v1889_v6 = vpop.permute.xlu0 %1888 }
0x24d8   :  { %v1891_v11 = vmul.f32 %v1889_v6, %v1885_v10 }
0x24da   :  { %1893 = vrot.lane.b32.xlu1 %v1891_v11, %s2785_s17 }
0x254c   :  { %v1894_v9 = vpop.permute.xlu1 %1893 }
0x254d   :  { %v1896_v53 = vadd.f32 %v1894_v9, %v1886_v8 }
0x254f   :  { %2684 = vtanh.f32 %v1896_v53 }
0x255c   :  { %v2685_v26 = vpop.eup %2684 }
0x255d   :  { %1899 = vrot.lane.b32.xlu0 %v2685_v26, %s2784_s5 }
0x25cf   :  { %v1900_v12 = vpop.permute.xlu0 %1899 }
0x25d0   :  { %v1902_v13 = vmul.f32 %v1900_v12, %v1885_v10 }
0x25d2   :  { %1905 = vrot.lane.b32.xlu1 %v1902_v13, %s2785_s17 }
0x2644   :  { %v1906_v14 = vpop.permute.xlu1 %1905 }
0x2645   :  { %2567 = vmatmul.mubr.msk.f32.vlgmr.msra.gmra.mxu1 %vm247_vm5, %v1906_v14 }
0x2646   :  { %2612 = vmatprep.mubr.msk.f32.mxu1 %vm2782_vm0, %v2781_v0  ;;  %2581 = vmatpush3.msra.mxu1 %v2021_v34 }
0x2647   :  { %2582 = vmatprep.subr.mxu1 %v2781_v0 }
0x2648   :  { %2583 = vmatpush3.msra.mxu1 %v2020_v36 }
0x2649   :  { %2584 = vmatprep.subr.mxu1 %v2781_v0 }
0x264a   :  { %2585 = vmatpush3.msra.mxu1 %v2019_v37 }
0x264b   :  { %2586 = vmatprep.subr.mxu1 %v2781_v0 }
0x264c   :  { %2587 = vmatpush3.msra.mxu1 %v2018_v38 }
0x264d   :  { %2588 = vmatprep.subr.mxu1 %v2781_v0 }
0x264e   :  { %2589 = vmatpush3.msra.mxu1 %v2017_v39 }
0x264f   :  { %2590 = vmatprep.subr.mxu1 %v2781_v0 }
0x2650   :  { %2591 = vmatpush3.msra.mxu1 %v2016_v40 }
0x2651   :  { %2592 = vmatprep.subr.mxu1 %v2781_v0 }
0x2652   :  { %2593 = vmatpush3.msra.mxu1 %v2015_v43 }
0x2653   :  { %2594 = vmatprep.subr.mxu1 %v2781_v0 }
0x2654   :  { %2595 = vmatpush3.msra.mxu1 %v2014_v47 }
0x2655   :  { %2596 = vmatprep.subr.mxu1 %v2781_v0 }
0x2656   :  { %2597 = vmatpush3.msra.mxu1 %v2013_v48 }
0x2657   :  { %2598 = vmatprep.subr.mxu1 %v2781_v0 }
0x2658   :  { %2599 = vmatpush3.msra.mxu1 %v2012_v44 }
0x2659   :  { %2600 = vmatprep.subr.mxu1 %v2781_v0 }
0x265a   :  { %2601 = vmatpush3.msra.mxu1 %v2011_v49 }
0x265b   :  { %2602 = vmatprep.subr.mxu1 %v2781_v0 }
0x265c   :  { %2603 = vmatpush3.msra.mxu1 %v2010_v51 }
0x265d   :  { %2604 = vmatprep.subr.mxu1 %v2781_v0 }
0x265e   :  { %2605 = vmatpush3.msra.mxu1 %v2009_v54 }
0x265f   :  { %2606 = vmatprep.subr.mxu1 %v2781_v0 }
0x2660   :  { %2607 = vmatpush3.msra.mxu1 %v2008_v21 }
0x2661   :  { %2608 = vmatprep.subr.mxu1 %v2781_v0 }
0x2662   :  { %2609 = vmatpush3.msra.mxu1 %v2007_v57 }
0x2663   :  { %2610 = vmatprep.subr.mxu1 %v2781_v0 }
0x2664   :  { %2611 = vmatpush3.msra.mxu1 %v2006_v45 }
0x2705   :  { %v1975_v16 = vpop.f32.mrf.mxu1 }
0x2706   :  { %v1979_v17 = vadd.f32 %v1975_v16, %v1211_v15 }
0x2707   :  { %v2568_v18 = vpop.f32.mrf.mxu1 }
0x2708   :  { %v1980_v19 = vmul.f32 %v1979_v17, %v2962_v35 }
0x270a   :  { %2686 = vtanh.f32 %v1980_v19 }
0x2717   :  { %v2687_v20 = vpop.eup %2686 }
0x2718   :  { %v1982_v22 = vmul.f32 %v2687_v20, %v2962_v35  ;;  %v2001_v35 = vld [vmem:[#allocation7] sm:$0xff] }
0x2719   :  { %2576 = vmatpush3.msra.mxu0 %v2001_v35 }
0x271a   :  { %v1983_v23 = vadd.f32 %v1982_v22, %v2965_v41 }
0x271c   :  { %1986 = vrot.lane.b32.xlu0 %v1983_v23, %s2784_s5  ;;  %v1984_v27 = vmul.f32 %v1983_v23, %v1896_v53 }
0x278e   :  { %v1987_v24 = vpop.permute.xlu0 %1986 }
0x278f   :  { %v1989_v25 = vmul.f32 %v1987_v24, %v1983_v23 }
0x2791   :  { %1991 = vrot.lane.b32.xlu1 %v1989_v25, %s2785_s17 }
0x2803   :  { %v1992_v29 = vpop.permute.xlu1 %1991 }
0x2804   :  { %v1994_v56 = vadd.f32 %v1992_v29, %v1984_v27 }
0x2806   :  { %2688 = vtanh.f32 %v1994_v56 }
0x2813   :  { %v2689_v41 = vpop.eup %2688 }
0x2814   :  { %1997 = vrot.lane.b32.xlu0 %v2689_v41, %s2784_s5 }
0x2886   :  { %v1998_v42 = vpop.permute.xlu0 %1997 }
0x2887   :  { %v2000_v33 = vmul.f32 %v1998_v42, %v1983_v23 }
0x2889   :  { %2030 = vrot.lane.b32.xlu1 %v2000_v33, %s2785_s17 }
0x28fb   :  { %v2031_v55 = vpop.permute.xlu1 %2030 }
0x28fc   :  { %2578 = vmatmul.mubr.msk.f32.vlgmr.msra.gmra.mxu0 %vm247_vm5, %v2031_v55 }
0x29bc   :  { %v2100_v46 = vpop.f32.mrf.mxu0 }
0x29bd   :  { %v2101_v59 = vadd.f32 %v2230_v58, %v2100_v46 }
0x29be   :  { %v2579_v28 = vpop.f32.mrf.mxu0 }
0x29bf   :  { %v2104_v50 = vmax.f32 %v2101_v59, 0.0 }
0x29c1   :  { %2613 = vmatmul.mubr.f32.vlgmr.msra.gmra.mxu1 %v2104_v50 }
0x2a81   :  { %v2177_v61 = vpop.f32.mrf.mxu1 }
0x2a82   :  { %v2178_v62 = vadd.f32 %v2232_v60, %v2177_v61 }
0x2a83   :  { %v2614_v0 = vpop.f32.mrf.mxu1 }
0x2a84   :  { %2181 = vst [vmem:[#allocation10] sm:$0xff] %v2178_v62 }
0x2a85   :  { %2761 = shalt.err (!%p2758_p5)
}
0x2a86   :  { %2191 = dma.vmem_to_hbm [thread:$0]  %s2189_s30, 128, %s3337_s11, [#allocation6]  }
0x2a87   :  { %2774 = dma.done.wait [#allocation6], 128  }
0x2a88   :  { %2775 = vsyncadd [#allocation6], 4294967168 }
0x2a89   :  { %2195 = vsyncpa [#allocation5], 1 }
0x2a8a   :  { %2196 = vsyncpa [#allocation8], 1 }
0x2a8b   :  { %2197 = vsyncpa [#allocation6], 1 }

</bundles_post_ra>
